<compile_context>
chip_gen: v6e
topology: v6e:2x2x1
jax: 0.10.0
libtpu: 0.0.40
codegen_flags: <defaults>
</compile_context>

<pallas_src>
import functools

import jax
import jax.numpy as jnp
from jax import lax
from jax.experimental import pallas as pl
from jax.experimental.pallas import tpu as pltpu


def _masked_wce_kernel(seed_ref,                                # scalar prefetch (SMEM)
                       x_ref, w_ref, b_ref, lab_ref, wm_ref,    # inputs
                       logits_ref, ploss_ref,                   # outputs
                       *, dropout_p, num_classes, tile_n, vp):
    i = pl.program_id(0)

    # ---- dense head: [tile_n, H] @ [H, Vp] + b  (bf16 in, f32 accumulate) ---
    z = jnp.dot(x_ref[...], w_ref[...], preferred_element_type=jnp.float32)
    z = z + b_ref[...]

    # ---- inverted dropout on the logits (train mode), trace-time gated -----
    if dropout_p > 0.0:
        # Counter-based hash (murmur3 finalizer) over the global element index.
        # Pure VPU integer ops -> lowers on TPU and in interpret mode alike.
        # TODO(synk): RNG stream differs from torch's dropout RNG; inverted-
        # dropout semantics (scale by 1/(1-p), zero dropped logits) match.
        row = lax.broadcasted_iota(jnp.uint32, z.shape, 0)
        col = lax.broadcasted_iota(jnp.uint32, z.shape, 1)
        base = lax.convert_element_type(i * tile_n, jnp.uint32)
        seed_u = lax.convert_element_type(seed_ref[0], jnp.uint32)
        gidx = (base + row) * jnp.uint32(vp) + col
        h = gidx ^ (seed_u * jnp.uint32(0x9E3779B9))
        h = (h ^ (h >> 16)) * jnp.uint32(0x85EBCA6B)
        h = (h ^ (h >> 13)) * jnp.uint32(0xC2B2AE35)
        h = h ^ (h >> 16)
        # NOTE: threshold has a 1/2^32 bias (negligible); dropout_p == 1.0 is
        # rejected in the wrapper (would overflow to 0 here).
        thresh = jnp.uint32(int(dropout_p * 4294967296.0))
        keep = h >= thresh
        z = jnp.where(keep, z * (1.0 / (1.0 - dropout_p)), 0.0)

    # torch returns dropout(logits); padded class columns are sliced off in
    # the wrapper.
    logits_ref[...] = z

    # ---- weighted cross entropy, reduction='none' per token ----------------
    col_i = lax.broadcasted_iota(jnp.int32, z.shape, 1)
    valid = col_i < num_classes                       # mask the padded classes
    z_ce = jnp.where(valid, z, -1e30)
    m = jnp.max(z_ce, axis=-1, keepdims=True)
    lse = m + jnp.log(jnp.sum(jnp.exp(z_ce - m), axis=-1, keepdims=True))
    onehot = (col_i == lab_ref[...]).astype(jnp.float32)         # [tile_n, Vp]
    z_y = jnp.sum(z_ce * onehot, axis=-1, keepdims=True)         # picked logit
    # wm_ref already holds class_weights[label] * loss_mask (gathered in the
    # wrapper), so no per-step class-weight one-hot reduce is needed here.
    ploss_ref[...] = wm_ref[...] * (lse - z_y)                   # [tile_n, 1]


def masked_weighted_loss(input_ids, attention_mask, labels, loss_mask,
                         embedding, w_head, b_head, class_weights,
                         *, dropout_p=0.1, seed=0, tile_n=256):
    assert 0.0 <= float(dropout_p) < 1.0
    B, S = input_ids.shape
    H = embedding.shape[1]
    V = w_head.shape[1]
    N = B * S

    # Pad token rows to a multiple of tile_n and classes to a multiple of 128
    # (lane-dense logits stores; padded rows contribute 0 via wmask = 0).
    Np = ((N + tile_n - 1) // tile_n) * tile_n
    Vp = ((V + 127) // 128) * 128

    # ---- base-model glue (plain JAX): embedding gather + attention mask ----
    hidden = embedding[input_ids] * attention_mask[..., None].astype(embedding.dtype)
    x = hidden.reshape(N, H)

    lab = labels.reshape(N).astype(jnp.int32)
    lm = (jnp.ones((N,), jnp.float32) if loss_mask is None
          else loss_mask.reshape(N).astype(jnp.float32))
    # Gather the class weight per token here (cheap O(N) XLA gather) and fuse
    # it with loss_mask: one per-row scalar for the kernel.
    wmask = lm * class_weights.astype(jnp.float32)[lab]

    x_p = jnp.pad(x.astype(jnp.float32), ((0, Np - N), (0, 0))).astype(jnp.bfloat16)
    lab_p = jnp.pad(lab, (0, Np - N)).reshape(Np, 1)
    wmask_p = jnp.pad(wmask, (0, Np - N)).reshape(Np, 1)

    w_p = jnp.pad(w_head.astype(jnp.float32), ((0, 0), (0, Vp - V))).astype(jnp.bfloat16)
    b_p = jnp.pad(b_head.astype(jnp.float32), (0, Vp - V)).reshape(1, Vp)

    seed_arr = jnp.array([seed], dtype=jnp.int32)

    kernel = functools.partial(_masked_wce_kernel,
                               dropout_p=float(dropout_p),
                               num_classes=V, tile_n=tile_n, vp=Vp)

    # TODO(synk): for realistic vocab sizes (V >= a few thousand) add a second
    # grid axis over V-chunks with an online logsumexp carried in VMEM scratch
    # so the full (H, Vp) weight block is never resident (v7x: 64 MiB VMEM).
    logits_pad, per_tok = pl.pallas_call(
        kernel,
        out_shape=(jax.ShapeDtypeStruct((Np, Vp), jnp.float32),
                   jax.ShapeDtypeStruct((Np, 1), jnp.float32)),
        grid_spec=pltpu.PrefetchScalarGridSpec(
            num_scalar_prefetch=1,
            grid=(Np // tile_n,),
            in_specs=[
                pl.BlockSpec((tile_n, H), lambda i, s: (i, 0)),   # x (bf16)
                pl.BlockSpec((H, Vp),     lambda i, s: (0, 0)),   # w_head (bf16)
                pl.BlockSpec((1, Vp),     lambda i, s: (0, 0)),   # bias
                pl.BlockSpec((tile_n, 1), lambda i, s: (i, 0)),   # labels
                pl.BlockSpec((tile_n, 1), lambda i, s: (i, 0)),   # weight*mask
            ],
            out_specs=[
                pl.BlockSpec((tile_n, Vp), lambda i, s: (i, 0)),  # logits
                pl.BlockSpec((tile_n, 1),  lambda i, s: (i, 0)),  # per-token loss
            ],
        ),
        compiler_params=pltpu.CompilerParams(
            dimension_semantics=("parallel",),        # no resident state -> megacore OK
            vmem_limit_bytes=48 * 1024 * 1024),
    )(seed_arr, x_p, w_p, b_p, lab_p, wmask_p)

    # Plain mean over ALL N tokens (matches .mean() after reduction='none').
    loss = jnp.sum(per_tok[:N]) / N
    logits = logits_pad[:N, :V].reshape(B, S, V)
    return loss, logits


def _reference(input_ids, attention_mask, labels, loss_mask,
               embedding, w_head, b_head, class_weights):
    # Pure-JAX f32 reference (no dropout) for a sanity check.
    hidden = embedding[input_ids] * attention_mask[..., None].astype(jnp.float32)
    logits = hidden @ w_head + b_head
    V = w_head.shape[1]
    z = logits.reshape(-1, V)
    lab = labels.reshape(-1)
    lse = jax.nn.logsumexp(z, axis=-1)
    z_y = jnp.take_along_axis(z, lab[:, None], axis=-1)[:, 0]
    per = class_weights[lab] * (lse - z_y)
    return (loss_mask.reshape(-1) * per).mean(), logits


if __name__ == "__main__":
    # small shapes: batch=2, seq=8, input vocab=32, hidden=32, num classes=16
    B, S, VOCAB_IN, H, V = 2, 8, 32, 32, 16

    key = jax.random.PRNGKey(0)
    k_emb, k_w, k_b, k_ids, k_lab, k_lm = jax.random.split(key, 6)

    # deterministic parameters (synthetic base model + class weights)
    embedding = jax.random.normal(k_emb, (VOCAB_IN, H), dtype=jnp.float32) * 0.1
    w_head = jax.random.normal(k_w, (H, V), dtype=jnp.float32) * 0.1
    b_head = jax.random.normal(k_b, (V,), dtype=jnp.float32) * 0.01
    class_weights = jnp.linspace(0.5, 1.5, V, dtype=jnp.float32)

    # deterministic example inputs
    input_ids = jax.random.randint(k_ids, (B, S), 0, VOCAB_IN, dtype=jnp.int32)
    attention_mask = jnp.ones((B, S), dtype=jnp.int32)
    labels = jax.random.randint(k_lab, (B, S), 0, V, dtype=jnp.int32)
    loss_mask = (jax.random.uniform(k_lm, (B, S)) > 0.3).astype(jnp.float32)

    # train-mode run (dropout on)
    loss, logits = masked_weighted_loss(
        input_ids, attention_mask, labels, loss_mask,
        embedding, w_head, b_head, class_weights,
        dropout_p=0.1, seed=1234)
    jax.block_until_ready((loss, logits))
    assert logits.shape == (B, S, V)
    assert loss.shape == ()

    # eval-mode run (dropout off) vs pure-JAX reference (bf16 MXU tolerance)
    loss0, logits0 = masked_weighted_loss(
        input_ids, attention_mask, labels, loss_mask,
        embedding, w_head, b_head, class_weights,
        dropout_p=0.0, seed=0)
    loss_ref, logits_ref = _reference(
        input_ids, attention_mask, labels, loss_mask,
        embedding, w_head, b_head, class_weights)
    jax.block_until_ready((loss0, logits0, loss_ref, logits_ref))
    assert abs(float(loss0) - float(loss_ref)) < 2e-2 * max(1.0, abs(float(loss_ref)))
    assert float(jnp.max(jnp.abs(logits0 - logits_ref))) < 2e-2

    print("KERNEL_OK")
</pallas_src>

<mosaic_0001>
module attributes {stable_mosaic.version = 11 : i64} {
  func.func @_masked_wce_kernel(%arg0: i32, %arg1: memref<1xi32, #tpu.memory_space<smem>>, %arg2: memref<256x32xbf16, #tpu.memory_space<vmem>>, %arg3: memref<32x128xbf16, #tpu.memory_space<vmem>>, %arg4: memref<1x128xf32, #tpu.memory_space<vmem>>, %arg5: memref<256x1xi32, #tpu.memory_space<vmem>>, %arg6: memref<256x1xf32, #tpu.memory_space<vmem>>, %arg7: memref<256x128xf32, #tpu.memory_space<vmem>>, %arg8: memref<256x1xf32, #tpu.memory_space<vmem>>) attributes {dimension_semantics = [#tpu.dimension_semantics<parallel>], iteration_bounds = array<i64: 1>, scalar_prefetch = 1 : i64, scratch_operands = 0 : i64, tpu.core_type = #tpu.core_type<tc>, window_params = [{transform_indices = @transform_0, window_bounds = array<i64: 256, 32>}, {pipeline_mode = #tpu.pipeline_mode<synchronous>, transform_indices = @transform_1, window_bounds = array<i64: 32, 128>}, {pipeline_mode = #tpu.pipeline_mode<synchronous>, transform_indices = @transform_2, window_bounds = array<i64: 1, 128>}, {transform_indices = @transform_3, window_bounds = array<i64: 256, 1>}, {transform_indices = @transform_4, window_bounds = array<i64: 256, 1>}, {transform_indices = @transform_5, window_bounds = array<i64: 256, 128>}, {transform_indices = @transform_6, window_bounds = array<i64: 256, 1>}]} {
    %c0 = arith.constant 0 : index
    %c0_0 = arith.constant 0 : index
    %0 = vector.load %arg2[%c0, %c0_0] : memref<256x32xbf16, #tpu.memory_space<vmem>>, vector<256x32xbf16>
    %c0_1 = arith.constant 0 : index
    %c0_2 = arith.constant 0 : index
    %1 = vector.load %arg3[%c0_1, %c0_2] : memref<32x128xbf16, #tpu.memory_space<vmem>>, vector<32x128xbf16>
    %cst = arith.constant dense<0.000000e+00> : vector<256x128xf32>
    %2 = tpu.matmul %0, %1, %cst {dimension_numbers = #tpu.dot_dimension_numbers<[1], [0], [0], [1], [0, 0, 1, 1], [], []>} : vector<256x32xbf16>, vector<32x128xbf16>, vector<256x128xf32> -> vector<256x128xf32>
    %c0_3 = arith.constant 0 : index
    %c0_4 = arith.constant 0 : index
    %3 = vector.load %arg4[%c0_3, %c0_4] : memref<1x128xf32, #tpu.memory_space<vmem>>, vector<1x128xf32>
    %4 = vector.broadcast %3 : vector<1x128xf32> to vector<256x128xf32>
    %5 = arith.addf %2, %4 : vector<256x128xf32>
    %6 = tpu.iota {dimensions = array<i32: 0>} : vector<256x128xi32>
    %7 = tpu.iota {dimensions = array<i32: 1>} : vector<256x128xi32>
    %c256_i32 = arith.constant 256 : i32
    %8 = arith.muli %arg0, %c256_i32 : i32
    %c0_5 = arith.constant 0 : index
    %9 = memref.load %arg1[%c0_5] : memref<1xi32, #tpu.memory_space<smem>>
    %10 = vector.broadcast %8 : i32 to vector<256x128xi32>
    %11 = arith.addi %10, %6 : vector<256x128xi32>
    %c128_i32 = arith.constant 128 : i32
    %12 = vector.broadcast %c128_i32 : i32 to vector<256x128xi32>
    %13 = arith.muli %11, %12 : vector<256x128xi32>
    %14 = arith.addi %13, %7 : vector<256x128xi32>
    %c-1640531527_i32 = arith.constant -1640531527 : i32
    %15 = arith.muli %9, %c-1640531527_i32 : i32
    %16 = vector.broadcast %15 : i32 to vector<256x128xi32>
    %17 = arith.xori %14, %16 : vector<256x128xi32>
    %c16_i32 = arith.constant 16 : i32
    %18 = vector.broadcast %c16_i32 : i32 to vector<256x128xi32>
    %19 = arith.shrui %17, %18 : vector<256x128xi32>
    %20 = arith.xori %17, %19 : vector<256x128xi32>
    %c-2048144789_i32 = arith.constant -2048144789 : i32
    %21 = vector.broadcast %c-2048144789_i32 : i32 to vector<256x128xi32>
    %22 = arith.muli %20, %21 : vector<256x128xi32>
    %c13_i32 = arith.constant 13 : i32
    %23 = vector.broadcast %c13_i32 : i32 to vector<256x128xi32>
    %24 = arith.shrui %22, %23 : vector<256x128xi32>
    %25 = arith.xori %22, %24 : vector<256x128xi32>
    %c-1028477387_i32 = arith.constant -1028477387 : i32
    %26 = vector.broadcast %c-1028477387_i32 : i32 to vector<256x128xi32>
    %27 = arith.muli %25, %26 : vector<256x128xi32>
    %c16_i32_6 = arith.constant 16 : i32
    %28 = vector.broadcast %c16_i32_6 : i32 to vector<256x128xi32>
    %29 = arith.shrui %27, %28 : vector<256x128xi32>
    %30 = arith.xori %27, %29 : vector<256x128xi32>
    %c429496729_i32 = arith.constant 429496729 : i32
    %31 = vector.broadcast %c429496729_i32 : i32 to vector<256x128xi32>
    %32 = arith.cmpi uge, %30, %31 : vector<256x128xi32>
    %cst_7 = arith.constant 1.11111116 : f32
    %33 = vector.broadcast %cst_7 : f32 to vector<256x128xf32>
    %34 = arith.mulf %5, %33 : vector<256x128xf32>
    %cst_8 = arith.constant 0.000000e+00 : f32
    %35 = vector.broadcast %cst_8 : f32 to vector<256x128xf32>
    %36 = arith.select %32, %34, %35 : vector<256x128xi1>, vector<256x128xf32>
    %c0_9 = arith.constant 0 : index
    %c0_10 = arith.constant 0 : index
    %37 = vector.load %arg7[%c0_9, %c0_10] : memref<256x128xf32, #tpu.memory_space<vmem>>, vector<256x128xf32>
    tpu.vector_store %arg7[%c0_9, %c0_10], %36 {strides = array<i32>} : memref<256x128xf32, #tpu.memory_space<vmem>>, vector<256x128xf32>,
    %38 = tpu.iota {dimensions = array<i32: 1>} : vector<256x128xi32>
    %c16_i32_11 = arith.constant 16 : i32
    %39 = vector.broadcast %c16_i32_11 : i32 to vector<256x128xi32>
    %40 = arith.cmpi slt, %38, %39 : vector<256x128xi32>
    %cst_12 = arith.constant -1.000000e+30 : f32
    %41 = vector.broadcast %cst_12 : f32 to vector<256x128xf32>
    %42 = arith.select %40, %36, %41 : vector<256x128xi1>, vector<256x128xf32>
    %cst_13 = arith.constant dense<0xFF800000> : vector<256xf32>
    %43 = vector.multi_reduction <maximumf>, %42, %cst_13 [1] : vector<256x128xf32> to vector<256xf32>
    %44 = vector.shape_cast %43 : vector<256xf32> to vector<256x1xf32>
    %45 = vector.broadcast %44 : vector<256x1xf32> to vector<256x128xf32>
    %46 = arith.subf %42, %45 : vector<256x128xf32>
    %47 = math.exp %46 : vector<256x128xf32>
    %cst_14 = arith.constant dense<0.000000e+00> : vector<256xf32>
    %48 = vector.multi_reduction <add>, %47, %cst_14 [1] : vector<256x128xf32> to vector<256xf32>
    %49 = vector.shape_cast %48 : vector<256xf32> to vector<256x1xf32>
    %50 = math.log %49 : vector<256x1xf32>
    %51 = arith.addf %44, %50 : vector<256x1xf32>
    %c0_15 = arith.constant 0 : index
    %c0_16 = arith.constant 0 : index
    %52 = vector.load %arg5[%c0_15, %c0_16] : memref<256x1xi32, #tpu.memory_space<vmem>>, vector<256x1xi32>
    %53 = vector.broadcast %52 : vector<256x1xi32> to vector<256x128xi32>
    %54 = arith.cmpi eq, %38, %53 : vector<256x128xi32>
    %55 = arith.extui %54 : vector<256x128xi1> to vector<256x128xi32>
    %56 = arith.sitofp %55 : vector<256x128xi32> to vector<256x128xf32>
    %57 = arith.mulf %42, %56 : vector<256x128xf32>
    %cst_17 = arith.constant dense<0.000000e+00> : vector<256xf32>
    %58 = vector.multi_reduction <add>, %57, %cst_17 [1] : vector<256x128xf32> to vector<256xf32>
    %59 = vector.shape_cast %58 : vector<256xf32> to vector<256x1xf32>
    %c0_18 = arith.constant 0 : index
    %c0_19 = arith.constant 0 : index
    %60 = vector.load %arg6[%c0_18, %c0_19] : memref<256x1xf32, #tpu.memory_space<vmem>>, vector<256x1xf32>
    %61 = arith.subf %51, %59 : vector<256x1xf32>
    %62 = arith.mulf %60, %61 : vector<256x1xf32>
    %c0_20 = arith.constant 0 : index
    %c0_21 = arith.constant 0 : index
    %63 = vector.load %arg8[%c0_20, %c0_21] : memref<256x1xf32, #tpu.memory_space<vmem>>, vector<256x1xf32>
    tpu.vector_store %arg8[%c0_20, %c0_21], %62 {strides = array<i32>} : memref<256x1xf32, #tpu.memory_space<vmem>>, vector<256x1xf32>,
    return
  }
  func.func @transform_0(%arg0: i32, %arg1: memref<1xi32, #tpu.memory_space<smem>>) -> (i32, i32) {
    %c0_i32 = arith.constant 0 : i32
    %c0_i32_0 = arith.constant 0 : i32
    return %arg0, %c0_i32 : i32, i32
  }
  func.func @transform_1(%arg0: i32, %arg1: memref<1xi32, #tpu.memory_space<smem>>) -> (i32, i32) {
    %c0_i32 = arith.constant 0 : i32
    %c0_i32_0 = arith.constant 0 : i32
    %c0_i32_1 = arith.constant 0 : i32
    return %c0_i32, %c0_i32_0 : i32, i32
  }
  func.func @transform_2(%arg0: i32, %arg1: memref<1xi32, #tpu.memory_space<smem>>) -> (i32, i32) {
    %c0_i32 = arith.constant 0 : i32
    %c0_i32_0 = arith.constant 0 : i32
    %c0_i32_1 = arith.constant 0 : i32
    return %c0_i32, %c0_i32_0 : i32, i32
  }
  func.func @transform_3(%arg0: i32, %arg1: memref<1xi32, #tpu.memory_space<smem>>) -> (i32, i32) {
    %c0_i32 = arith.constant 0 : i32
    %c0_i32_0 = arith.constant 0 : i32
    return %arg0, %c0_i32 : i32, i32
  }
  func.func @transform_4(%arg0: i32, %arg1: memref<1xi32, #tpu.memory_space<smem>>) -> (i32, i32) {
    %c0_i32 = arith.constant 0 : i32
    %c0_i32_0 = arith.constant 0 : i32
    return %arg0, %c0_i32 : i32, i32
  }
  func.func @transform_5(%arg0: i32, %arg1: memref<1xi32, #tpu.memory_space<smem>>) -> (i32, i32) {
    %c0_i32 = arith.constant 0 : i32
    %c0_i32_0 = arith.constant 0 : i32
    return %arg0, %c0_i32 : i32, i32
  }
  func.func @transform_6(%arg0: i32, %arg1: memref<1xi32, #tpu.memory_space<smem>>) -> (i32, i32) {
    %c0_i32 = arith.constant 0 : i32
    %c0_i32_0 = arith.constant 0 : i32
    return %arg0, %c0_i32 : i32, i32
  }
}

</mosaic_0001>

<bundles_post_ra>
// kernel: tpu_custom_call.1
= control target key start
LH: loop header
LB: loop body
LE: loop exit
PB: predicated region body
PF: predicated region fallthrough
CT: control target
= control target key end

     0   :  { %vm161_vm0 = vcmask 261120   ;;  %v2045_v6 = vmov 0   ;;  %s3499_s0 = inlined_call_operand.<no memory space> [shape: s32[1], index: 0, kind: input, shape index: {}]   ;;  %s3500_s1 = inlined_call_operand.vmem [shape: bf16[256,32], index: 1, kind: input, shape index: {}]   ;;  %s3501_s2 = inlined_call_operand.vmem [shape: bf16[32,128], index: 2, kind: input, shape index: {}]   ;;  %s3502_s3 = inlined_call_operand.vmem [shape: f32[1,128], index: 3, kind: input, shape index: {}]   ;;  %s3503_s4 = inlined_call_operand.vmem [shape: s32[256,1], index: 4, kind: input, shape index: {}]   ;;  %s3504_s5 = inlined_call_operand.vmem [shape: f32[256,1], index: 5, kind: input, shape index: {}]   ;;  %s3505_s6 = inlined_call_operand.hbm [shape: f32[256,128], index: 6, kind: output, shape index: {0}]   ;;  %s3506_s7 = inlined_call_operand.vmem [shape: f32[256,1], index: 7, kind: output, shape index: {1}]  }
   0x1   :  { %v1877_v0 = vld [vmem:[%s3501_s2 + $0x8] sm:$0xff]   ;;  %v1878_v1 = vld [vmem:[%s3501_s2] sm:$0xff]   ;;  %1876 = vset.pattern.permute.xlu1 %v2045_v6  ;;  %1875 = vset.pattern.permute.xlu0 %v2045_v6  ;;  %v1883_v8 = vld [vmem:[%s3500_s1 + $0x10] sm:$0xff]  }
   0x2   :  { %1830 = vmatprep.subr.bf16.mxu0 %v1877_v0  ;;  %1866 = vmatprep.subr.bf16.mxu1 %v1877_v0  ;;  %v1879_v2 = vld [vmem:[%s3500_s1] sm:$0xff]   ;;  %v1881_v4 = vld [vmem:[%s3500_s1 + $0x8] sm:$0xff]   ;;  %v1884_v9 = vld [vmem:[%s3500_s1 + $0x50] sm:$0xff]  }
   0x3   :  { %1831 = vmatpush3.bf16.msra.mxu0 %v1877_v0  ;;  %1868 = vmatpush3.bf16.msra.mxu1 %v1877_v0  ;;  %v1880_v3 = vld [vmem:[%s3500_s1 + $0x40] sm:$0xff]   ;;  %v1882_v5 = vld [vmem:[%s3500_s1 + $0x48] sm:$0xff]   ;;  %v1278_v10 = vld [vmem:[%s3503_s4 + $0x10] sm:$0xff] }
   0x4   :  { %1832 = vmatprep.subr.bf16.mxu0 %v1878_v1  ;;  %1867 = vmatprep.subr.bf16.mxu1 %v1878_v1  ;;  %v1277_v7 = vld [vmem:[%s3503_s4 + $0x8] sm:$0xff]  ;;  %v1885_v11 = vld [vmem:[%s3500_s1 + $0x18] sm:$0xff]   ;;  %v1887_v14 = vld [vmem:[%s3500_s1 + $0x20] sm:$0xff]  }
   0x5   :  { %1834 = vmatprep.mubr.msk.bf16.mxu0 %vm161_vm0, %v1879_v2  ;;  %1850 = vmatprep.mubr.msk.bf16.mxu1 %vm161_vm0, %v1880_v3  ;;  %v1279_v12 = vld [vmem:[%s3503_s4 + $0x18] sm:$0xff]  ;;  %v1888_v15 = vld [vmem:[%s3500_s1 + $0x60] sm:$0xff]   ;;  %v1281_v18 = vld [vmem:[%s3503_s4 + $0x28] sm:$0xff] }
   0x6   :  { %1312 = vperm.xlu1 %1876, %v1277_v7   ;;  %v1886_v13 = vld [vmem:[%s3500_s1 + $0x58] sm:$0xff]   ;;  %v1280_v16 = vld [vmem:[%s3503_s4 + $0x20] sm:$0xff]  ;;  %v1889_v19 = vld [vmem:[%s3500_s1 + $0x28] sm:$0xff]  }
   0x7   :  { %1833 = vmatpush3.bf16.msra.mxu0 %v1878_v1  ;;  %1869 = vmatpush3.bf16.msra.mxu1 %v1878_v1  ;;  %v1276_v17 = vld [vmem:[%s3503_s4] sm:$0xff]  ;;  %v1890_v20 = vld [vmem:[%s3500_s1 + $0x68] sm:$0xff]   ;;  %v1891_v22 = vld [vmem:[%s3500_s1 + $0x30] sm:$0xff]  }
   0x8   :  { %1309 = vperm.xlu0 %1875, %v1276_v17   ;;  %v1285_v21 = vld [vmem:[%s3503_s4 + $0x48] sm:$0xff]  ;;  %v1892_v23 = vld [vmem:[%s3500_s1 + $0x70] sm:$0xff]   ;;  %v1287_v25 = vld [vmem:[%s3503_s4 + $0x58] sm:$0xff] }
   0x9   :  { %v1282_v24 = vld [vmem:[%s3503_s4 + $0x30] sm:$0xff] }
   0xa   :  { %1835 = vmatmul.mubr.msk.bf16.vlgmr.msra.gmra.mxu0 %vm161_vm0, %v1881_v4  ;;  %1851 = vmatmul.mubr.msk.bf16.vlgmr.msra.gmra.mxu1 %vm161_vm0, %v1882_v5 }
   0xb   :  { %1838 = vmatprep.mubr.msk.bf16.mxu0 %vm161_vm0, %v1883_v8  ;;  %1854 = vmatprep.mubr.msk.bf16.mxu1 %vm161_vm0, %v1884_v9 }
   0xc   :  { %1315 = vperm.xlu1 %1876, %v1278_v10   ;;  %1336 = vperm.xlu0 %1875, %v1285_v21  }
  0x10   :  { %1318 = vperm.xlu1 %1876, %v1279_v12  }
  0x12   :  { %1839 = vmatmul.mubr.msk.bf16.gmra.mxu0 %vm161_vm0, %v1885_v11  ;;  %1855 = vmatmul.mubr.msk.bf16.gmra.mxu1 %vm161_vm0, %v1886_v13 }
  0x13   :  { %1842 = vmatprep.mubr.msk.bf16.mxu0 %vm161_vm0, %v1887_v14  ;;  %1858 = vmatprep.mubr.msk.bf16.mxu1 %vm161_vm0, %v1888_v15 }
  0x14   :  { %1321 = vperm.xlu1 %1876, %v1280_v16  }
  0x18   :  { %1324 = vperm.xlu1 %1876, %v1281_v18  }
  0x1a   :  { %1843 = vmatmul.mubr.msk.bf16.gmra.mxu0 %vm161_vm0, %v1889_v19  ;;  %1859 = vmatmul.mubr.msk.bf16.gmra.mxu1 %vm161_vm0, %v1890_v20 }
  0x1b   :  { %1846 = vmatprep.mubr.msk.bf16.mxu0 %vm161_vm0, %v1891_v22  ;;  %1862 = vmatprep.mubr.msk.bf16.mxu1 %vm161_vm0, %v1892_v23 }
  0x1c   :  { %1327 = vperm.xlu1 %1876, %v1282_v24  }
  0x1d   :  { %14 = vsyncpa [#allocation5], 0  ;;  %v1283_v26 = vld [vmem:[%s3503_s4 + $0x38] sm:$0xff]  ;;  %1342 = vperm.xlu0 %1875, %v1287_v25   ;;  %v1289_v29 = vld [vmem:[%s3503_s4 + $0x68] sm:$0xff]  ;;  %v371_v51 = vlaneseq  ;;  %s505_s28 = smul.u32 2654435769, %s3499_s0 }
  0x1e   :  { %v1893_v27 = vld [vmem:[%s3500_s1 + $0x38] sm:$0xff]   ;;  %v1284_v30 = vld [vmem:[%s3503_s4 + $0x40] sm:$0xff]  ;;  %v1286_v32 = vld [vmem:[%s3503_s4 + $0x50] sm:$0xff] }
  0x1f   :  { %v1894_v28 = vld [vmem:[%s3500_s1 + $0x78] sm:$0xff]   ;;  %v1293_v33 = vld [vmem:[%s3503_s4 + $0x88] sm:$0xff]  ;;  %v1288_v34 = vld [vmem:[%s3503_s4 + $0x60] sm:$0xff]  ;;  %v2256_v52 = vshrl.u32 %v371_v51, 7  ;;  %v2259_v54 = vand.u32 127, %v371_v51  ;;  %v2266_v58 = vstv %s505_s28 }
  0x20   :  { %1330 = vperm.xlu1 %1876, %v1283_v26   ;;  %v1291_v31 = vld [vmem:[%s3503_s4 + $0x78] sm:$0xff]  ;;  %v1290_v36 = vld [vmem:[%s3503_s4 + $0x70] sm:$0xff]  ;;  %v1297_v37 = vld [vmem:[%s3503_s4 + $0xa8] sm:$0xff] }
  0x21   :  { %1348 = vperm.xlu0 %1875, %v1289_v29   ;;  %v1295_v35 = vld [vmem:[%s3503_s4 + $0x98] sm:$0xff]  ;;  %v1292_v38 = vld [vmem:[%s3503_s4 + $0x80] sm:$0xff]  ;;  %v1294_v40 = vld [vmem:[%s3503_s4 + $0x90] sm:$0xff]  ;;  %v390_v53 = vadd.s32 144, %v2256_v52  ;;  %v374_v57 = vadd.s32 16, %v2256_v52  ;;  %v388_v61 = vadd.s32 128, %v2256_v52 }
  0x22   :  { %1847 = vmatmul.mubr.msk.bf16.gmra.mxu0 %vm161_vm0, %v1893_v27  ;;  %1863 = vmatmul.mubr.msk.bf16.gmra.mxu1 %vm161_vm0, %v1894_v28  ;;  %v1299_v39 = vld [vmem:[%s3503_s4 + $0xb8] sm:$0xff]  ;;  %v1301_v41 = vld [vmem:[%s3503_s4 + $0xc8] sm:$0xff]  ;;  %v1296_v42 = vld [vmem:[%s3503_s4 + $0xa0] sm:$0xff]  ;;  %v375_v62 = vadd.s32 24, %v2256_v52  ;;  %v441_v63 = vmul.u32 128, %v2256_v52  ;;  %v391_v0 = vadd.s32 152, %v2256_v52 }
  0x23   :  { %v1303_v43 = vld [vmem:[%s3503_s4 + $0xd8] sm:$0xff]  ;;  %v1298_v44 = vld [vmem:[%s3503_s4 + $0xb0] sm:$0xff]  ;;  %v1305_v45 = vld [vmem:[%s3503_s4 + $0xe8] sm:$0xff]  ;;  %v459_v55 = vmul.u32 128, %v390_v53  ;;  %v443_v60 = vmul.u32 128, %v374_v57  ;;  %v373_v4 = vadd.s32 8, %v2256_v52 }
  0x24   :  { %1333 = vperm.xlu1 %1876, %v1284_v30   ;;  %v1300_v46 = vld [vmem:[%s3503_s4 + $0xc0] sm:$0xff]  ;;  %v1307_v47 = vld [vmem:[%s3503_s4 + $0xf8] sm:$0xff]  ;;  %v1302_v48 = vld [vmem:[%s3503_s4 + $0xd0] sm:$0xff]  ;;  %v457_v3 = vmul.u32 128, %v388_v61  ;;  %v444_v5 = vmul.u32 128, %v375_v62  ;;  %v473_v6 = vadd.s32 %v441_v63, %v2259_v54  ;;  %v389_v7 = vadd.s32 136, %v2256_v52 }
  0x25   :  { %1354 = vperm.xlu0 %1875, %v1291_v31   ;;  %v1304_v49 = vld [vmem:[%s3503_s4 + $0xe0] sm:$0xff]  ;;  %v1306_v50 = vld [vmem:[%s3503_s4 + $0xf0] sm:$0xff]  ;;  %v491_v56 = vadd.s32 %v459_v55, %v2259_v54  ;;  %v475_v2 = vadd.s32 %v443_v60, %v2259_v54  ;;  %v378_v8 = vadd.s32 48, %v2256_v52  ;;  %v460_v9 = vmul.u32 128, %v391_v0 }
  0x26   :  { %v489_v12 = vadd.s32 %v457_v3, %v2259_v54  ;;  %v442_v13 = vmul.u32 128, %v373_v4  ;;  %v476_v14 = vadd.s32 %v444_v5, %v2259_v54  ;;  %v507_v15 = vxor.u32 %v2266_v58, %v473_v6 }
  0x27   :  { %v525_v59 = vxor.u32 %v2266_v58, %v491_v56  ;;  %v509_v11 = vxor.u32 %v2266_v58, %v475_v2  ;;  %v458_v16 = vmul.u32 128, %v389_v7  ;;  %v447_v17 = vmul.u32 128, %v378_v8 }
  0x28   :  { %1339 = vperm.xlu1 %1876, %v1286_v32   ;;  %v492_v18 = vadd.s32 %v460_v9, %v2259_v54  ;;  %v394_v19 = vadd.s32 176, %v2256_v52  ;;  %v523_v22 = vxor.u32 %v2266_v58, %v489_v12  ;;  %v474_v23 = vadd.s32 %v442_v13, %v2259_v54 }
  0x29   :  { %1360 = vperm.xlu0 %1875, %v1293_v33   ;;  %v557_v1 = vshrl.u32 %v525_v59, 16  ;;  %v541_v21 = vshrl.u32 %v509_v11, 16  ;;  %v379_v24 = vadd.s32 56, %v2256_v52  ;;  %v510_v25 = vxor.u32 %v2266_v58, %v476_v14 }
  0x2a   :  { %v539_v26 = vshrl.u32 %v507_v15, 16  ;;  %v490_v27 = vadd.s32 %v458_v16, %v2259_v54  ;;  %v479_v28 = vadd.s32 %v447_v17, %v2259_v54  ;;  %v526_v29 = vxor.u32 %v2266_v58, %v492_v18 }
  0x2b   :  { %v589_v10 = vxor.u32 %v557_v1, %v525_v59  ;;  %v463_v30 = vmul.u32 128, %v394_v19  ;;  %v573_v32 = vxor.u32 %v541_v21, %v509_v11  ;;  %v555_v33 = vshrl.u32 %v523_v22, 16 }
  0x2c   :  { %1345 = vperm.xlu1 %1876, %v1288_v34   ;;  %v508_v34 = vxor.u32 %v2266_v58, %v474_v23  ;;  %v392_v11 = vadd.s32 160, %v2256_v52  ;;  %vm923_vm7 = vcmp.lt.s32.totalorder %v2259_v54, 16 }
  0x2d   :  { %1366 = vperm.xlu0 %1875, %v1295_v35   ;;  %v621_v20 = vmul.u32 2246822507, %v589_v10  ;;  %v448_v35 = vmul.u32 128, %v379_v24 }
  0x2f   :  { %v653_v31 = vshrl.u32 %v621_v20, 13 }
  0x30   :  { %1351 = vperm.xlu1 %1876, %v1290_v36   ;;  %v395_v36 = vadd.s32 184, %v2256_v52 }
  0x31   :  { %1372 = vperm.xlu0 %1875, %v1297_v37   ;;  %v542_v37 = vshrl.u32 %v510_v25, 16 }
  0x33   :  { %v574_v51 = vxor.u32 %v542_v37, %v510_v25 }
  0x34   :  { %1357 = vperm.xlu1 %1876, %v1292_v38   ;;  %v571_v38 = vxor.u32 %v539_v26, %v507_v15  ;;  %v461_v26 = vmul.u32 128, %v392_v11 }
  0x35   :  { %1378 = vperm.xlu0 %1875, %v1299_v39   ;;  %v524_v39 = vxor.u32 %v2266_v58, %v490_v27  ;;  %v606_v4 = vmul.u32 2246822507, %v574_v51 }
  0x36   :  { %v603_v53 = vmul.u32 2246822507, %v571_v38 }
  0x37   :  { %v556_v55 = vshrl.u32 %v524_v39, 16  ;;  %v638_v19 = vshrl.u32 %v606_v4, 13 }
  0x38   :  { %1363 = vperm.xlu1 %1876, %v1294_v40   ;;  %v513_v40 = vxor.u32 %v2266_v58, %v479_v28  ;;  %v635_v5 = vshrl.u32 %v603_v53, 13 }
  0x39   :  { %1384 = vperm.xlu0 %1875, %v1301_v41   ;;  %v558_v41 = vshrl.u32 %v526_v29, 16  ;;  %v588_v6 = vxor.u32 %v556_v55, %v524_v39 }
  0x3a   :  { %v545_v56 = vshrl.u32 %v513_v40, 16 }
  0x3b   :  { %v590_v57 = vxor.u32 %v558_v41, %v526_v29  ;;  %v620_v21 = vmul.u32 2246822507, %v588_v6 }
  0x3c   :  { %1369 = vperm.xlu1 %1876, %v1296_v42   ;;  %v495_v42 = vadd.s32 %v463_v30, %v2259_v54  ;;  %v577_v7 = vxor.u32 %v545_v56, %v513_v40 }
  0x3d   :  { %1390 = vperm.xlu0 %1875, %v1303_v43   ;;  %v376_v43 = vadd.s32 32, %v2256_v52  ;;  %v622_v8 = vmul.u32 2246822507, %v590_v57  ;;  %v652_v37 = vshrl.u32 %v620_v21, 13 }
  0x3e   :  { %v529_v59 = vxor.u32 %v2266_v58, %v495_v42  ;;  %v493_v42 = vadd.s32 %v461_v26, %v2259_v54 }
  0x3f   :  { %v445_v60 = vmul.u32 128, %v376_v43  ;;  %v654_v23 = vshrl.u32 %v622_v8, 13  ;;  %v684_v55 = vxor.u32 %v652_v37, %v620_v21 }
  0x40   :  { %1375 = vperm.xlu1 %1876, %v1298_v44   ;;  %v685_v44 = vxor.u32 %v653_v31, %v621_v20  ;;  %v561_v9 = vshrl.u32 %v529_v59, 16  ;;  %v667_v20 = vxor.u32 %v635_v5, %v603_v53 }
  0x41   :  { %1396 = vperm.xlu0 %1875, %v1305_v45   ;;  %v605_v45 = vmul.u32 2246822507, %v573_v32  ;;  %v477_v10 = vadd.s32 %v445_v60, %v2259_v54  ;;  %v686_v39 = vxor.u32 %v654_v23, %v622_v8  ;;  %v716_v8 = vmul.u32 3266489909, %v684_v55 }
  0x42   :  { %v717_v61 = vmul.u32 3266489909, %v685_v44  ;;  %v593_v24 = vxor.u32 %v561_v9, %v529_v59 }
  0x43   :  { %v637_v62 = vshrl.u32 %v605_v45, 13  ;;  %v511_v25 = vxor.u32 %v2266_v58, %v477_v10  ;;  %v718_v57 = vmul.u32 3266489909, %v686_v39  ;;  %v748_v23 = vshrl.u32 %v716_v8, 16 }
  0x44   :  { %1381 = vperm.xlu1 %1876, %v1300_v46   ;;  %v587_v46 = vxor.u32 %v555_v33, %v523_v22  ;;  %v749_v12 = vshrl.u32 %v717_v61, 16  ;;  %v609_v22 = vmul.u32 2246822507, %v577_v7  ;;  %v625_v40 = vmul.u32 2246822507, %v593_v24 }
  0x45   :  { %1402 = vperm.xlu0 %1875, %v1307_v47   ;;  %v540_v47 = vshrl.u32 %v508_v34, 16  ;;  %v669_v13 = vxor.u32 %v637_v62, %v605_v45  ;;  %v543_v41 = vshrl.u32 %v511_v25, 16  ;;  %v2333_v39 = vxor.u32 %v748_v23, %v716_v8 }
  0x46   :  { %v619_v63 = vmul.u32 2246822507, %v587_v46  ;;  %v2307_v27 = vxor.u32 %v749_v12, %v717_v61  ;;  %v641_v38 = vshrl.u32 %v609_v22, 13  ;;  %v382_v46 = vadd.s32 80, %v2256_v52 }
  0x47   :  { %v572_v0 = vxor.u32 %v540_v47, %v508_v34  ;;  %v701_v28 = vmul.u32 3266489909, %v669_v13  ;;  %v393_v34 = vadd.s32 168, %v2256_v52  ;;  %v657_v59 = vshrl.u32 %v625_v40, 13 }
  0x48   :  { %1387 = vperm.xlu1 %1876, %v1302_v48   ;;  %v480_v48 = vadd.s32 %v448_v35, %v2259_v54  ;;  %v651_v14 = vshrl.u32 %v619_v63, 13  ;;  %v670_v35 = vxor.u32 %v638_v19, %v606_v4  ;;  %v673_v56 = vxor.u32 %v641_v38, %v609_v22 }
  0x49   :  { %v604_v15 = vmul.u32 2246822507, %v572_v0  ;;  %v733_v43 = vshrl.u32 %v701_v28, 16  ;;  %v575_v60 = vxor.u32 %v543_v41, %v511_v25  ;;  %v527_v61 = vxor.u32 %v2266_v58, %v493_v42 }
  0x4a   :  { %v514_v1 = vxor.u32 %v2266_v58, %v480_v48  ;;  %v683_v29 = vxor.u32 %v651_v14, %v619_v63  ;;  %v702_v51 = vmul.u32 3266489909, %v670_v35  ;;  %v705_v9 = vmul.u32 3266489909, %v673_v56 }
  0x4b   :  { %v636_v30 = vshrl.u32 %v604_v15, 13  ;;  %v2314_v62 = vxor.u32 %v733_v43, %v701_v28  ;;  %v689_v10 = vxor.u32 %v657_v59, %v625_v40  ;;  %v607_v11 = vmul.u32 2246822507, %v575_v60 }
  0x4c   :  { %1393 = vperm.xlu1 %1876, %v1304_v49   ;;  %v464_v49 = vmul.u32 128, %v395_v36  ;;  %v546_v16 = vshrl.u32 %v514_v1, 16  ;;  %v699_v36 = vmul.u32 3266489909, %v667_v20  ;;  %v734_v6 = vshrl.u32 %v702_v51, 16 }
  0x4d   :  { %v715_v44 = vmul.u32 3266489909, %v683_v29  ;;  %v668_v45 = vxor.u32 %v636_v30, %v604_v15  ;;  %v559_v12 = vshrl.u32 %v527_v61, 16  ;;  %v383_v13 = vadd.s32 88, %v2256_v52 }
  0x4e   :  { %v496_v2 = vadd.s32 %v464_v49, %v2259_v54  ;;  %v578_v31 = vxor.u32 %v546_v16, %v514_v1  ;;  %v731_v53 = vshrl.u32 %v699_v36, 16  ;;  %v451_v1 = vmul.u32 128, %v382_v46 }
  0x4f   :  { %v747_v63 = vshrl.u32 %v715_v44, 16  ;;  %v700_v0 = vmul.u32 3266489909, %v668_v45  ;;  %v750_v14 = vshrl.u32 %v718_v57, 16  ;;  %v2324_v22 = vxor.u32 %v734_v6, %v702_v51 }
  0x50   :  { %1399 = vperm.xlu1 %1876, %v1306_v50   ;;  %v377_v50 = vadd.s32 40, %v2256_v52  ;;  %v530_v17 = vxor.u32 %v2266_v58, %v496_v2  ;;  %v610_v47 = vmul.u32 2246822507, %v578_v31  ;;  %v2317_v7 = vxor.u32 %v731_v53, %v699_v36 }
  0x51   :  { %v2320_v15 = vxor.u32 %v747_v63, %v715_v44  ;;  %v732_v16 = vshrl.u32 %v700_v0, 16  ;;  %v737_v24 = vshrl.u32 %v705_v9, 16  ;;  %v398_v25 = vadd.s32 208, %v2256_v52 }
  0x52   :  { %v446_v3 = vmul.u32 128, %v377_v50  ;;  %v562_v32 = vshrl.u32 %v530_v17, 16  ;;  %v462_v50 = vmul.u32 128, %v393_v34  ;;  %v642_v2 = vshrl.u32 %v610_v47, 13 }
  0x53   :  { %v721_v26 = vmul.u32 3266489909, %v689_v10  ;;  %v639_v28 = vshrl.u32 %v607_v11, 13  ;;  %v591_v29 = vxor.u32 %v559_v12, %v527_v61  ;;  %v452_v30 = vmul.u32 128, %v383_v13 }
  0x54   :  { %v478_v18 = vadd.s32 %v446_v3, %v2259_v54  ;;  %v594_v48 = vxor.u32 %v562_v32, %v530_v17  ;;  %v494_v5 = vadd.s32 %v462_v50, %v2259_v54  ;;  %v483_v17 = vadd.s32 %v451_v1, %v2259_v54 }
  0x55   :  { %v2327_v31 = vxor.u32 %v750_v14, %v718_v57  ;;  %v2329_v32 = vxor.u32 %v732_v16, %v700_v0  ;;  %v399_v34 = vadd.s32 216, %v2256_v52  ;;  %v2335_v40 = vxor.u32 %v737_v24, %v705_v9 }
  0x56   :  { %v512_v33 = vxor.u32 %v2266_v58, %v478_v18  ;;  %v626_v3 = vmul.u32 2246822507, %v594_v48  ;;  %v674_v18 = vxor.u32 %v642_v2, %v610_v47  ;;  %v528_v21 = vxor.u32 %v2266_v58, %v494_v5 }
  0x57   :  { %v467_v41 = vmul.u32 128, %v398_v25  ;;  %v380_v42 = vadd.s32 64, %v2256_v52  ;;  %v753_v43 = vshrl.u32 %v721_v26, 16  ;;  %v671_v44 = vxor.u32 %v639_v28, %v607_v11 }
  0x58   :  { %v544_v49 = vshrl.u32 %v512_v33, 16  ;;  %v658_v19 = vshrl.u32 %v626_v3, 13  ;;  %v706_v35 = vmul.u32 3266489909, %v674_v18  ;;  %v560_v38 = vshrl.u32 %v528_v21, 16 }
  0x59   :  { %v623_v45 = vmul.u32 2246822507, %v591_v29  ;;  %v484_v46 = vadd.s32 %v452_v30, %v2259_v54  ;;  %v468_v48 = vmul.u32 128, %v399_v34  ;;  %v396_v50 = vadd.s32 192, %v2256_v52 }
  0x5a   :  { %v576_v4 = vxor.u32 %v544_v49, %v512_v33  ;;  %v517_v33 = vxor.u32 %v2266_v58, %v483_v17  ;;  %v690_v36 = vxor.u32 %v658_v19, %v626_v3  ;;  %v381_v49 = vadd.s32 72, %v2256_v52 }
  0x5b   :  { %v738_v51 = vshrl.u32 %v706_v35, 16  ;;  %v592_v56 = vxor.u32 %v560_v38, %v528_v21  ;;  %v499_v57 = vadd.s32 %v467_v41, %v2259_v54  ;;  %v449_v59 = vmul.u32 128, %v380_v42 }
  0x5c   :  { %v608_v20 = vmul.u32 2246822507, %v576_v4  ;;  %v549_v47 = vshrl.u32 %v517_v33, 16  ;;  %v722_v53 = vmul.u32 3266489909, %v690_v36  ;;  %v397_v60 = vadd.s32 200, %v2256_v52 }
  0x5d   :  { %v386_v61 = vadd.s32 112, %v2256_v52  ;;  %v703_v63 = vmul.u32 3266489909, %v671_v44  ;;  %v655_v0 = vshrl.u32 %v623_v45, 13  ;;  %v518_v1 = vxor.u32 %v2266_v58, %v484_v46 }
  0x5e   :  { %v640_v37 = vshrl.u32 %v608_v20, 13  ;;  %v387_v2 = vadd.s32 120, %v2256_v52  ;;  %v581_v3 = vxor.u32 %v549_v47, %v517_v33  ;;  %v500_v4 = vadd.s32 %v468_v48, %v2259_v54 }
  0x5f   :  { %v450_v5 = vmul.u32 128, %v381_v49  ;;  %v465_v6 = vmul.u32 128, %v396_v50  ;;  %v2349_v8 = vxor.u32 %v753_v43, %v721_v26  ;;  %v754_v9 = vshrl.u32 %v722_v53, 16 }
  0x60   :  { %v2341_v55 = vxor.u32 %v640_v37, %v608_v20  ;;  %v624_v11 = vmul.u32 2246822507, %v592_v56  ;;  %v533_v12 = vxor.u32 %v2266_v58, %v499_v57  ;;  %v481_v13 = vadd.s32 %v449_v59, %v2259_v54 }
  0x61   :  { %v466_v14 = vmul.u32 128, %v397_v60  ;;  %v455_v16 = vmul.u32 128, %v386_v61  ;;  %v2354_v17 = vxor.u32 %v738_v51, %v706_v35  ;;  %v687_v18 = vxor.u32 %v655_v0, %v623_v45 }
  0x62   :  { %v704_v10 = vmul.u32 3266489909, %v2341_v55  ;;  %v550_v19 = vshrl.u32 %v518_v1, 16  ;;  %v456_v20 = vmul.u32 128, %v387_v2  ;;  %v534_v23 = vxor.u32 %v2266_v58, %v500_v4 }
  0x63   :  { %v613_v21 = vmul.u32 2246822507, %v581_v3  ;;  %v482_v24 = vadd.s32 %v450_v5, %v2259_v54  ;;  %v497_v25 = vadd.s32 %v465_v6, %v2259_v54  ;;  %v2359_v26 = vxor.u32 %v754_v9, %v722_v53 }
  0x64   :  { %v735_v28 = vshrl.u32 %v703_v63, 16  ;;  %v736_v29 = vshrl.u32 %v704_v10, 16  ;;  %v402_v30 = vadd.s32 240, %v2256_v52  ;;  %v565_v33 = vshrl.u32 %v533_v12, 16 }
  0x65   :  { %v515_v34 = vxor.u32 %v2266_v58, %v481_v13  ;;  %v498_v35 = vadd.s32 %v466_v14, %v2259_v54  ;;  %v487_v36 = vadd.s32 %v455_v16, %v2259_v54  ;;  %v719_v37 = vmul.u32 3266489909, %v687_v18 }
  0x66   :  { %v656_v38 = vshrl.u32 %v624_v11, 13  ;;  %v582_v41 = vxor.u32 %v550_v19, %v518_v1  ;;  %v488_v42 = vadd.s32 %v456_v20, %v2259_v54  ;;  %v645_v43 = vshrl.u32 %v613_v21, 13 }
  0x67   :  { %v566_v44 = vshrl.u32 %v534_v23, 16  ;;  %v516_v45 = vxor.u32 %v2266_v58, %v482_v24  ;;  %v531_v46 = vxor.u32 %v2266_v58, %v497_v25  ;;  %v2368_v47 = vxor.u32 %v735_v28, %v703_v63 }
  0x68   :  { %v471_v48 = vmul.u32 128, %v402_v30  ;;  %v403_v49 = vadd.s32 248, %v2256_v52  ;;  %v384_v50 = vadd.s32 96, %v2256_v52  ;;  %v597_v51 = vxor.u32 %v565_v33, %v533_v12 }
  0x69   :  { %v547_v53 = vshrl.u32 %v515_v34, 16  ;;  %v532_v55 = vxor.u32 %v2266_v58, %v498_v35  ;;  %v521_v56 = vxor.u32 %v2266_v58, %v487_v36  ;;  %v751_v57 = vshrl.u32 %v719_v37, 16 }
  0x6a   :  { %v688_v59 = vxor.u32 %v656_v38, %v624_v11  ;;  %v614_v60 = vmul.u32 2246822507, %v582_v41  ;;  %v522_v61 = vxor.u32 %v2266_v58, %v488_v42  ;;  %v677_v0 = vxor.u32 %v645_v43, %v613_v21 }
  0x6b   :  { %v598_v1 = vxor.u32 %v566_v44, %v534_v23  ;;  %v548_v63 = vshrl.u32 %v516_v45, 16  ;;  %v563_v2 = vshrl.u32 %v531_v46, 16  ;;  %v2375_v3 = vxor.u32 %v736_v29, %v704_v10 }
  0x6c   :  { %v503_v4 = vadd.s32 %v471_v48, %v2259_v54  ;;  %v472_v5 = vmul.u32 128, %v403_v49  ;;  %v453_v6 = vmul.u32 128, %v384_v50  ;;  %v579_v12 = vxor.u32 %v547_v53, %v515_v34 }
  0x6d   :  { %v629_v9 = vmul.u32 2246822507, %v597_v51  ;;  %v564_v13 = vshrl.u32 %v532_v55, 16  ;;  %v553_v14 = vshrl.u32 %v521_v56, 16  ;;  %v2378_v16 = vxor.u32 %v751_v57, %v719_v37 }
  0x6e   :  { %v720_v11 = vmul.u32 3266489909, %v688_v59  ;;  %v646_v18 = vshrl.u32 %v614_v60, 13  ;;  %v554_v19 = vshrl.u32 %v522_v61, 16  ;;  %v709_v20 = vmul.u32 3266489909, %v677_v0 }
  0x6f   :  { %v630_v21 = vmul.u32 2246822507, %v598_v1  ;;  %v580_v23 = vxor.u32 %v548_v63, %v516_v45  ;;  %v595_v24 = vxor.u32 %v563_v2, %v531_v46  ;;  %v537_v10 = vxor.u32 %v2266_v58, %v503_v4 }
  0x70   :  { %v504_v25 = vadd.s32 %v472_v5, %v2259_v54  ;;  %v485_v28 = vadd.s32 %v453_v6, %v2259_v54  ;;  %v385_v29 = vadd.s32 104, %v2256_v52  ;;  %v661_v30 = vshrl.u32 %v629_v9, 13 }
  0x71   :  { %v611_v33 = vmul.u32 2246822507, %v579_v12  ;;  %v596_v34 = vxor.u32 %v564_v13, %v532_v55  ;;  %v585_v35 = vxor.u32 %v553_v14, %v521_v56  ;;  %v752_v36 = vshrl.u32 %v720_v11, 16 }
  0x72   :  { %v678_v37 = vxor.u32 %v646_v18, %v614_v60  ;;  %v586_v38 = vxor.u32 %v554_v19, %v522_v61  ;;  %v400_v41 = vadd.s32 224, %v2256_v52  ;;  %v741_v42 = vshrl.u32 %v709_v20, 16 }
  0x73   :  { %v662_v43 = vshrl.u32 %v630_v21, 13  ;;  %v612_v44 = vmul.u32 2246822507, %v580_v23  ;;  %v627_v45 = vmul.u32 2246822507, %v595_v24  ;;  %v569_v46 = vshrl.u32 %v537_v10, 16 }
  0x74   :  { %v538_v48 = vxor.u32 %v2266_v58, %v504_v25  ;;  %v519_v49 = vxor.u32 %v2266_v58, %v485_v28  ;;  %v454_v50 = vmul.u32 128, %v385_v29  ;;  %v693_v51 = vxor.u32 %v661_v30, %v629_v9 }
  0x75   :  { %v643_v53 = vshrl.u32 %v611_v33, 13  ;;  %v628_v57 = vmul.u32 2246822507, %v596_v34  ;;  %v617_v55 = vmul.u32 2246822507, %v585_v35  ;;  %v2387_v59 = vxor.u32 %v752_v36, %v720_v11 }
  0x76   :  { %v618_v60 = vmul.u32 2246822507, %v586_v38  ;;  %v469_v61 = vmul.u32 128, %v400_v41  ;;  %v401_v0 = vadd.s32 232, %v2256_v52  ;;  %v2390_v63 = vxor.u32 %v662_v43, %v630_v21 }
  0x77   :  { %v710_v1 = vmul.u32 3266489909, %v678_v37  ;;  %v644_v2 = vshrl.u32 %v612_v44, 13  ;;  %v659_v4 = vshrl.u32 %v627_v45, 13  ;;  %v601_v5 = vxor.u32 %v569_v46, %v537_v10 }
  0x78   :  { %v570_v6 = vshrl.u32 %v538_v48, 16  ;;  %v551_v12 = vshrl.u32 %v519_v49, 16  ;;  %v486_v9 = vadd.s32 %v454_v50, %v2259_v54  ;;  %v2393_v13 = vxor.u32 %v741_v42, %v709_v20 }
  0x79   :  { %v725_v14 = vmul.u32 3266489909, %v693_v51  ;;  %v675_v18 = vxor.u32 %v643_v53, %v611_v33  ;;  %v660_v11 = vshrl.u32 %v628_v57, 13  ;;  %v649_v19 = vshrl.u32 %v617_v55, 13 }
  0x7a   :  { %v650_v23 = vshrl.u32 %v618_v60, 13  ;;  %v501_v24 = vadd.s32 %v469_v61, %v2259_v54  ;;  %v470_v52 = vmul.u32 128, %v401_v0  ;;  %v742_v25 = vshrl.u32 %v710_v1, 16 }
  0x7b   :  { %v726_v21 = vmul.u32 3266489909, %v2390_v63  ;;  %v676_v28 = vxor.u32 %v644_v2, %v612_v44  ;;  %v691_v29 = vxor.u32 %v659_v4, %v627_v45  ;;  %v633_v30 = vmul.u32 2246822507, %v601_v5 }
  0x7c   :  { %v602_v34 = vxor.u32 %v570_v6, %v538_v48  ;;  %v583_v35 = vxor.u32 %v551_v12, %v519_v49  ;;  %v520_v20 = vxor.u32 %v2266_v58, %v486_v9  ;;  %v757_v33 = vshrl.u32 %v725_v14, 16 }
  0x7d   :  { %v707_v36 = vmul.u32 3266489909, %v675_v18  ;;  %v692_v37 = vxor.u32 %v660_v11, %v628_v57  ;;  %v2399_v38 = vxor.u32 %v649_v19, %v617_v55  ;;  %v2401_v41 = vxor.u32 %v650_v23, %v618_v60 }
  0x7e   :  { %v535_v42 = vxor.u32 %v2266_v58, %v501_v24  ;;  %v502_v43 = vadd.s32 %v470_v52, %v2259_v54  ;;  %v2405_v44 = vxor.u32 %v742_v25, %v710_v1  ;;  %v758_v45 = vshrl.u32 %v726_v21, 16  ;;  %v2436_v24 = vld [vmem:[%s3502_s3] ss:$0 sm:$0xff]  ;;  %s2047_s3 = smov [#allocation4]  }
  0x7f   :  { %v708_v46 = vmul.u32 3266489909, %v676_v28  ;;  %v723_v48 = vmul.u32 3266489909, %v691_v29  ;;  %v665_v49 = vshrl.u32 %v633_v30, 13  ;;  %v552_v53 = vshrl.u32 %v520_v20, 16 }
  0x80   :  { %v634_v50 = vmul.u32 2246822507, %v602_v34  ;;  %v615_v51 = vmul.u32 2246822507, %v583_v35  ;;  %v3507_v61 = vmov 0.0   ;;  %v2412_v55 = vxor.u32 %v757_v33, %v725_v14  ;;  %s1730_s29 = sshll.u32 %s2047_s3, 4  ;;  %s1731_s29 = int_to_ptr.vmem [resolvable:$true] %s1730_s29 }
  0x81   :  { %v1313_v56 = vpop.permute.xlu1 %1312  ;;  %v739_v60 = vshrl.u32 %v707_v36, 16  ;;  %v724_v0 = vmul.u32 3266489909, %v692_v37  ;;  %v713_v1 = vmul.u32 3266489909, %v2399_v38  ;;  %v567_v4 = vshrl.u32 %v535_v42, 16  ;;  %p2028_p1 = scmp.lt.s32.totalorder %s1731_s29, %s1731_s29 }
  0x82   :  { %vm1405_vm1 = vcmp.eq.s32.totalorder %v2259_v54, %v1313_v56  ;;  %v714_v2 = vmul.u32 3266489909, %v2401_v41  ;;  %v536_v5 = vxor.u32 %v2266_v58, %v502_v43  ;;  %vm813_vm4 = vcmp.ge.u32.totalorder %v2307_v27, 429496729  ;;  %s2023_s30 = scalar_lea.vmem %s1731_s29, 4096 }
  0x83   :  { %v2410_v57 = vsel %vm1405_vm1, 1.0, %v3507_v61  ;;  %vm797_vm5 = vcmp.ge.u32.totalorder %v2314_v62, 429496729  ;;  %v740_v56 = vshrl.u32 %v708_v46, 16  ;;  %v755_v6 = vshrl.u32 %v723_v48, 16  ;;  %v1310_v12 = vpop.permute.xlu0 %1309  ;;  %p2024_p0 = scmp.ne.s32.totalorder %s1731_s29, %s2023_s30  ;;  %p2029_p2 = scmp.lt.s32.totalorder %s2023_s30, %s2023_s30 }
  0x84   :  { %v2421_v9 = vxor.u32 %v665_v49, %v633_v30  ;;  %v666_v14 = vshrl.u32 %v634_v50, 13  ;;  %v647_v18 = vshrl.u32 %v615_v51, 13  ;;  %v2423_v11 = vxor.u32 %v552_v53, %v520_v20 }
  0x85   :  { %vm1404_vm6 = vcmp.eq.s32.totalorder %v2259_v54, %v1310_v12  ;;  %vm795_vm8 = vcmp.ge.u32.totalorder %v2317_v7, 429496729  ;;  %vm811_vm9 = vcmp.ge.u32.totalorder %v2320_v15, 429496729  ;;  %v2429_v58 = vxor.u32 %v758_v45, %v726_v21  ;;  %p2030_p3 = por %p2029_p2, %p2028_p1 }
  0x86   :  { %v2431_v19 = vxor.u32 %v739_v60, %v707_v36  ;;  %v756_v23 = vshrl.u32 %v724_v0, 16  ;;  %v745_v52 = vshrl.u32 %v713_v1, 16  ;;  %v746_v25 = vshrl.u32 %v714_v2, 16 }
  0x87   :  { %v1316_v10 = vpop.permute.xlu1 %1315  ;;  %v2438_v28 = vxor.u32 %v567_v4, %v535_v42  ;;  %v568_v29 = vshrl.u32 %v536_v5, 16  ;;  %vm798_vm10 = vcmp.ge.u32.totalorder %v2324_v22, 429496729  ;;  %vm814_vm11 = vcmp.ge.u32.totalorder %v2327_v31, 429496729  ;;  %p2031_p4 = pnand %p2030_p3, %p2024_p0 }
  0x88   :  { %vm1406_vm2 = vcmp.eq.s32.totalorder %v2259_v54, %v1316_v10  ;;  %v2452_v34 = vxor.u32 %v740_v56, %v708_v46  ;;  %v2454_v35 = vxor.u32 %v755_v6, %v723_v48  ;;  %v729_v36 = vmul.u32 3266489909, %v2421_v9 }
  0x89   :  { %v2445_v21 = vsel %vm1406_vm2, 1.0, %v3507_v61  ;;  %v2457_v37 = vxor.u32 %v666_v14, %v634_v50  ;;  %v2459_v38 = vxor.u32 %v647_v18, %v615_v51  ;;  %v616_v10 = vmul.u32 2246822507, %v2423_v11 }
  0x8a   :  { %v2467_v43 = vsel %vm1404_vm6, 1.0, %v3507_v61  ;;  %v2469_v45 = vxor.u32 %v756_v23, %v724_v0  ;;  %v2471_v49 = vxor.u32 %v745_v52, %v713_v1  ;;  %v2473_v50 = vxor.u32 %v746_v25, %v714_v2 }
  0x8b   :  { %v1319_v63 = vpop.permute.xlu1 %1318  ;;  %v631_v51 = vmul.u32 2246822507, %v2438_v28  ;;  %v2476_v53 = vxor.u32 %v568_v29, %v536_v5  ;;  %vm796_vm12 = vcmp.ge.u32.totalorder %v2329_v32, 429496729  ;;  %vm812_vm13 = vcmp.ge.u32.totalorder %v2333_v39, 429496729 }
  0x8c   :  { %vm1407_vm3 = vcmp.eq.s32.totalorder %v2259_v54, %v1319_v63  ;;  %vm801_vm14 = vcmp.ge.u32.totalorder %v2335_v40, 429496729  ;;  %v761_v2 = vshrl.u32 %v729_v36, 16  ;;  %v730_v5 = vmul.u32 3266489909, %v2457_v37 }
  0x8d   :  { %v2450_v30 = vsel %vm1407_vm3, 1.0, %v3507_v61  ;;  %v711_v6 = vmul.u32 3266489909, %v2459_v38  ;;  %v648_v12 = vshrl.u32 %v616_v10, 13  ;;  %vm817_vm15 = vcmp.ge.u32.totalorder %v2349_v8, 429496729 }
  0x8e   :  { %vm802_vm0 = vcmp.ge.u32.totalorder %v2354_v17, 429496729  ;;  %vm818_vm1 = vcmp.ge.u32.totalorder %v2359_v26, 429496729  ;;  %vm799_vm2 = vcmp.ge.u32.totalorder %v2368_v47, 429496729 }
  0x8f   :  { %vm800_vm3 = vcmp.ge.u32.totalorder %v2375_v3, 429496729  ;;  %v743_v22 = vshrl.u32 %v711_v6, 16  ;;  %vm805_vm6 = vcmp.ge.u32.totalorder %v2393_v13, 429496729 }
  0x91   :  { %v2618_v17 = vxor.u32 %v743_v22, %v711_v6 }
  0xca   :  { %v1836_v20 = vpop.f32.mrf.mxu0  ;;  %v1852_v33 = vpop.f32.mrf.mxu1 }
  0xcb   :  { %v253_v41 = vadd.f32 %v1836_v20, %v2436_v24  ;;  %v317_v42 = vadd.f32 %v1852_v33, %v2436_v24  ;;  %v663_v33 = vshrl.u32 %v631_v51, 13 }
  0xcc   :  { %v244_v46 = vpop.f32.mrf.mxu0  ;;  %v308_v48 = vpop.f32.mrf.mxu1 }
  0xcd   :  { %v829_v60 = vmul.f32 1.1111112, %v253_v41  ;;  %v845_v63 = vmul.f32 1.1111112, %v317_v42  ;;  %v245_v4 = vadd.f32 %v2436_v24, %v244_v46  ;;  %v309_v56 = vadd.f32 %v2436_v24, %v308_v48 }
  0xce   :  { %v1837_v0 = vpop.f32.mrf.mxu0  ;;  %v1853_v1 = vpop.f32.mrf.mxu1  ;;  %v632_v41 = vmul.u32 2246822507, %v2476_v53  ;;  %v2539_v31 = vxor.u32 %v663_v33, %v631_v51 }
  0xcf   :  { %v827_v14 = vmul.f32 1.1111112, %v245_v4  ;;  %v843_v18 = vmul.f32 1.1111112, %v309_v56  ;;  %v256_v11 = vadd.f32 %v1837_v0, %v2436_v24  ;;  %v320_v23 = vadd.f32 %v1853_v1, %v2436_v24 }
  0xd0   :  { %v247_v52 = vpop.f32.mrf.mxu0  ;;  %v311_v25 = vpop.f32.mrf.mxu1  ;;  %v877_v29 = vsel %vm813_vm4, %v845_v63, 0.0  ;;  %v861_v20 = vsel %vm797_vm5, %v829_v60, 0.0  ;;  %vm815_vm4 = vcmp.ge.u32.totalorder %v2378_v16, 429496729  ;;  %vm816_vm5 = vcmp.ge.u32.totalorder %v2387_v59, 429496729 }
  0xd1   :  { %v830_v42 = vmul.f32 1.1111112, %v256_v11  ;;  %v846_v46 = vmul.f32 1.1111112, %v320_v23  ;;  %v248_v48 = vadd.f32 %v2436_v24, %v247_v52  ;;  %v312_v4 = vadd.f32 %v2436_v24, %v311_v25  ;;  %909 = vst [vmem:[#allocation4 + $0x90] sm:$0xff] %v877_v29  ;;  %893 = vst [vmem:[#allocation4 + $0x10] sm:$0xff] %v861_v20 }
  0xd2   :  { %v2503_v27 = vsel %vm923_vm7, %v877_v29, -1e+30  ;;  %v2507_v62 = vsel %vm923_vm7, %v861_v20, -1e+30  ;;  %v1840_v60 = vpop.f32.mrf.mxu0  ;;  %v1856_v63 = vpop.f32.mrf.mxu1  ;;  %v859_v56 = vsel %vm795_vm8, %v827_v14, 0.0  ;;  %v875_v0 = vsel %vm811_vm9, %v843_v18, 0.0 }
  0xd3   :  { %v828_v1 = vmul.f32 1.1111112, %v248_v48  ;;  %992 = vmax.xlane.f32.xlu0 %v2503_v27  ;;  %960 = vmax.xlane.f32.xlu1 %v2507_v62  ;;  %v269_v11 = vadd.f32 %v1840_v60, %v2436_v24  ;;  %891 = vst [vmem:[#allocation4] sm:$0xff] %v859_v56  ;;  %907 = vst [vmem:[#allocation4 + $0x80] sm:$0xff] %v875_v0  ;;  %v2518_v23 = vshrl.u32 %v730_v5, 16  ;;  %v862_v25 = vsel %vm798_vm10, %v830_v42, 0.0 }
  0xd4   :  { %v2520_v52 = vxor.u32 %v648_v12, %v616_v10  ;;  %v844_v7 = vmul.f32 1.1111112, %v312_v4  ;;  %v333_v14 = vadd.f32 %v1856_v63, %v2436_v24  ;;  %v260_v15 = vpop.f32.mrf.mxu0  ;;  %v324_v18 = vpop.f32.mrf.mxu1  ;;  %v878_v29 = vsel %vm814_vm11, %v846_v46, 0.0  ;;  %894 = vst [vmem:[#allocation4 + $0x18] sm:$0xff] %v862_v25 }
  0xd5   :  { %v833_v20 = vmul.f32 1.1111112, %v269_v11  ;;  %910 = vst [vmem:[#allocation4 + $0x98] sm:$0xff] %v878_v29  ;;  %v2533_v10 = vxor.u32 %v761_v2, %v729_v36  ;;  %v261_v12 = vadd.f32 %v2436_v24, %v260_v15  ;;  %v2544_v42 = vsel %vm923_vm7, %v862_v25, -1e+30 }
  0xd6   :  { %v2548_v46 = vsel %vm923_vm7, %v859_v56, -1e+30  ;;  %v1841_v9 = vpop.f32.mrf.mxu0  ;;  %v1857_v36 = vpop.f32.mrf.mxu1  ;;  %v664_v2 = vshrl.u32 %v632_v41, 13  ;;  %v325_v48 = vadd.f32 %v2436_v24, %v324_v18  ;;  %v712_v33 = vmul.u32 3266489909, %v2520_v52 }
  0xd7   :  { %962 = vmax.xlane.f32.xlu1 %v2544_v42  ;;  %956 = vmax.xlane.f32.xlu0 %v2548_v46  ;;  %v272_v28 = vadd.f32 %v1841_v9, %v2436_v24  ;;  %v336_v51 = vadd.f32 %v1857_v36, %v2436_v24  ;;  %v849_v4 = vmul.f32 1.1111112, %v333_v14  ;;  %v860_v56 = vsel %vm796_vm12, %v828_v1, 0.0 }
  0xd8   :  { %v263_v60 = vpop.f32.mrf.mxu0  ;;  %v327_v63 = vpop.f32.mrf.mxu1  ;;  %v2562_v11 = vsel %vm812_vm13, %v844_v7, 0.0  ;;  %v2566_v15 = vsel %vm801_vm14, %v833_v20, 0.0  ;;  %892 = vst [vmem:[#allocation4 + $0x8] sm:$0xff] %v860_v56  ;;  %v2575_v32 = vsel %vm923_vm7, %v878_v29, -1e+30  ;;  %v2584_v14 = vxor.u32 %v664_v2, %v632_v41 }
  0xd9   :  { %v834_v18 = vmul.f32 1.1111112, %v272_v28  ;;  %v850_v25 = vmul.f32 1.1111112, %v336_v51  ;;  %v264_v9 = vadd.f32 %v2436_v24, %v263_v60  ;;  %v328_v36 = vadd.f32 %v2436_v24, %v327_v63  ;;  %908 = vst [vmem:[#allocation4 + $0x88] sm:$0xff] %v2562_v11  ;;  %897 = vst [vmem:[#allocation4 + $0x30] sm:$0xff] %v2566_v15 }
  0xda   :  { %v2579_v39 = vsel %vm923_vm7, %v875_v0, -1e+30  ;;  %v1844_v40 = vpop.f32.mrf.mxu0  ;;  %v1860_v1 = vpop.f32.mrf.mxu1  ;;  %v727_v7 = vmul.u32 3266489909, %v2539_v31  ;;  %v831_v20 = vmul.f32 1.1111112, %v261_v12  ;;  %v1500_v63 = vmul.f32 %v2467_v43, %v2548_v46 }
  0xdb   :  { %v847_v28 = vmul.f32 1.1111112, %v325_v48  ;;  %v832_v51 = vmul.f32 1.1111112, %v264_v9  ;;  %994 = vmax.xlane.f32.xlu1 %v2575_v32  ;;  %988 = vmax.xlane.f32.xlu0 %v2579_v39  ;;  %v285_v29 = vadd.f32 %v1844_v40, %v2436_v24  ;;  %vm806_vm8 = vcmp.ge.u32.totalorder %v2405_v44, 429496729 }
  0xdc   :  { %vm821_vm9 = vcmp.ge.u32.totalorder %v2412_v55, 429496729  ;;  %vm822_vm10 = vcmp.ge.u32.totalorder %v2429_v58, 429496729  ;;  %v848_v0 = vmul.f32 1.1111112, %v328_v36  ;;  %v276_v60 = vpop.f32.mrf.mxu0  ;;  %v340_v53 = vpop.f32.mrf.mxu1  ;;  %v1502_v48 = vmul.f32 %v2445_v21, %v2507_v62 }
  0xdd   :  { %v2594_v41 = vsel %vm817_vm15, %v849_v4, 0.0  ;;  %v2598_v12 = vsel %vm802_vm0, %v834_v18, 0.0  ;;  %v2602_v2 = vsel %vm818_vm1, %v850_v25, 0.0  ;;  %v2614_v8 = vxor.u32 %v2518_v23, %v730_v5 }
  0xde   :  { %913 = vst [vmem:[#allocation4 + $0xb0] sm:$0xff] %v2594_v41  ;;  %898 = vst [vmem:[#allocation4 + $0x38] sm:$0xff] %v2598_v12  ;;  %v349_v26 = vadd.f32 %v1860_v1, %v2436_v24  ;;  %v1845_v21 = vpop.f32.mrf.mxu0  ;;  %v1861_v4 = vpop.f32.mrf.mxu1  ;;  %v744_v43 = vshrl.u32 %v712_v33, 16  ;;  %v759_v18 = vshrl.u32 %v727_v7, 16  ;;  %v728_v25 = vmul.u32 3266489909, %v2584_v14 }
  0xdf   :  { %914 = vst [vmem:[#allocation4 + $0xb8] sm:$0xff] %v2602_v2  ;;  %v837_v37 = vmul.f32 1.1111112, %v285_v29  ;;  %1536 = vadd.xlane.f32.xlu0 %v1502_v48  ;;  %1532 = vadd.xlane.f32.xlu1 %v1500_v63  ;;  %v288_v5 = vadd.f32 %v1845_v21, %v2436_v24  ;;  %v352_v38 = vadd.f32 %v1861_v4, %v2436_v24  ;;  %v2630_v6 = vsel %vm923_vm7, %v860_v56, -1e+30  ;;  %v2652_v1 = vpop.permute.xlu1 %1321 }
  0xe0   :  { %vm803_vm11 = vcmp.ge.u32.totalorder %v2431_v19, 429496729  ;;  %vm804_vm12 = vcmp.ge.u32.totalorder %v2452_v34, 429496729  ;;  %vm819_vm13 = vcmp.ge.u32.totalorder %v2454_v35, 429496729  ;;  %v279_v23 = vpop.f32.mrf.mxu0  ;;  %v343_v22 = vpop.f32.mrf.mxu1  ;;  %v277_v29 = vadd.f32 %v2436_v24, %v276_v60 }
  0xe1   :  { %vm820_vm14 = vcmp.ge.u32.totalorder %v2469_v45, 429496729  ;;  %v2638_v9 = vsel %vm799_vm2, %v831_v20, 0.0  ;;  %v2642_v36 = vsel %vm800_vm3, %v832_v51, 0.0  ;;  %v2646_v56 = vsel %vm815_vm4, %v847_v28, 0.0 }
  0xe2   :  { %v2650_v40 = vsel %vm816_vm5, %v848_v0, 0.0  ;;  %v341_v47 = vadd.f32 %v2436_v24, %v340_v53  ;;  %v280_v20 = vadd.f32 %v2436_v24, %v279_v23  ;;  %v2660_v3 = vsel %vm923_vm7, %v2562_v11, -1e+30  ;;  %895 = vst [vmem:[#allocation4 + $0x20] sm:$0xff] %v2638_v9  ;;  %896 = vst [vmem:[#allocation4 + $0x28] sm:$0xff] %v2642_v36  ;;  %v1848_v0 = vpop.f32.mrf.mxu0  ;;  %v1864_v60 = vpop.f32.mrf.mxu1 }
  0xe3   :  { %911 = vst [vmem:[#allocation4 + $0xa0] sm:$0xff] %v2646_v56  ;;  %912 = vst [vmem:[#allocation4 + $0xa8] sm:$0xff] %v2650_v40  ;;  %v853_v16 = vmul.f32 1.1111112, %v349_v26  ;;  %v838_v59 = vmul.f32 1.1111112, %v288_v5  ;;  %v344_v51 = vadd.f32 %v2436_v24, %v343_v22  ;;  %958 = vmax.xlane.f32.xlu0 %v2630_v6  ;;  %990 = vmax.xlane.f32.xlu1 %v2660_v3  ;;  %v2710_v22 = vpop.permute.xlu1 %1324 }
  0xe4   :  { %v854_v28 = vmul.f32 1.1111112, %v352_v38  ;;  %vm809_vm15 = vcmp.ge.u32.totalorder %v2471_v49, 429496729  ;;  %vm810_vm0 = vcmp.ge.u32.totalorder %v2473_v50, 429496729  ;;  %v1503_v11 = vmul.f32 %v2450_v30, %v2544_v42  ;;  %v292_v4 = vpop.f32.mrf.mxu0  ;;  %v356_v5 = vpop.f32.mrf.mxu1 }
  0xe5   :  { %vm825_vm1 = vcmp.ge.u32.totalorder %v2533_v10, 429496729  ;;  %v2676_v53 = vxor.u32 %v744_v43, %v712_v33  ;;  %v2680_v48 = vxor.u32 %v759_v18, %v727_v7  ;;  %v760_v63 = vshrl.u32 %v728_v25, 16 }
  0xe6   :  { %v301_v26 = vadd.f32 %v1848_v0, %v2436_v24  ;;  %v365_v21 = vadd.f32 %v1864_v60, %v2436_v24  ;;  %v2689_v30 = vsel %vm923_vm7, %v2566_v15, -1e+30  ;;  %v2693_v52 = vsel %vm805_vm6, %v837_v37, 0.0  ;;  %v1849_v38 = vpop.f32.mrf.mxu0  ;;  %v1865_v23 = vpop.f32.mrf.mxu1 }
  0xe7   :  { %vm826_vm2 = vcmp.ge.u32.totalorder %v2614_v8, 429496729  ;;  %v835_v31 = vmul.f32 1.1111112, %v277_v29  ;;  %v851_v33 = vmul.f32 1.1111112, %v341_v47  ;;  %v293_v43 = vadd.f32 %v2436_v24, %v292_v4  ;;  %968 = vmax.xlane.f32.xlu0 %v2689_v30  ;;  %1538 = vadd.xlane.f32.xlu1 %v1503_v11 }
  0xe8   :  { %v836_v7 = vmul.f32 1.1111112, %v280_v20  ;;  %901 = vst [vmem:[#allocation4 + $0x50] sm:$0xff] %v2693_v52  ;;  %v852_v18 = vmul.f32 1.1111112, %v344_v51  ;;  %v2700_v15 = vsel %vm806_vm8, %v838_v59, 0.0  ;;  %v357_v29 = vadd.f32 %v2436_v24, %v356_v5  ;;  %v359_v59 = vpop.f32.mrf.mxu1 }
  0xe9   :  { %v2704_v13 = vsel %vm821_vm9, %v853_v16, 0.0  ;;  %v2708_v37 = vsel %vm822_vm10, %v854_v28, 0.0  ;;  %v304_v47 = vadd.f32 %v1849_v38, %v2436_v24  ;;  %v368_v44 = vadd.f32 %v1865_v23, %v2436_v24  ;;  %902 = vst [vmem:[#allocation4 + $0x58] sm:$0xff] %v2700_v15  ;;  %v295_v16 = vpop.f32.mrf.mxu0 }
  0xea   :  { %v2719_v55 = vsel %vm923_vm7, %v2594_v41, -1e+30  ;;  %917 = vst [vmem:[#allocation4 + $0xd0] sm:$0xff] %v2704_v13  ;;  %918 = vst [vmem:[#allocation4 + $0xd8] sm:$0xff] %v2708_v37  ;;  %v841_v58 = vmul.f32 1.1111112, %v301_v26  ;;  %v792_v51 = vxor.u32 %v760_v63, %v728_v25  ;;  %v296_v60 = vadd.f32 %v2436_v24, %v295_v16 }
  0xeb   :  { %v857_v20 = vmul.f32 1.1111112, %v365_v21  ;;  %v2727_v28 = vsel %vm923_vm7, %v2598_v12, -1e+30  ;;  %v839_v41 = vmul.f32 1.1111112, %v293_v43  ;;  %v360_v11 = vadd.f32 %v2436_v24, %v359_v59  ;;  %1000 = vmax.xlane.f32.xlu0 %v2719_v55 }
  0xec   :  { %v842_v0 = vmul.f32 1.1111112, %v304_v47  ;;  %v2735_v26 = vsel %vm803_vm11, %v835_v31, 0.0  ;;  %v2739_v21 = vsel %vm804_vm12, %v836_v7, 0.0  ;;  %v2743_v12 = vsel %vm819_vm13, %v851_v33, 0.0  ;;  %970 = vmax.xlane.f32.xlu1 %v2727_v28 }
  0xed   :  { %v2747_v14 = vsel %vm820_vm14, %v852_v18, 0.0  ;;  %v855_v25 = vmul.f32 1.1111112, %v357_v29  ;;  %v858_v63 = vmul.f32 1.1111112, %v368_v44  ;;  %899 = vst [vmem:[#allocation4 + $0x40] sm:$0xff] %v2735_v26  ;;  %v1501_v19 = vmul.f32 %v2410_v57, %v2630_v6  ;;  %v1328_v57 = vpop.permute.xlu1 %1327 }
  0xee   :  { %v840_v4 = vmul.f32 1.1111112, %v296_v60  ;;  %900 = vst [vmem:[#allocation4 + $0x48] sm:$0xff] %v2739_v21  ;;  %915 = vst [vmem:[#allocation4 + $0xc0] sm:$0xff] %v2743_v12  ;;  %vm807_vm3 = vcmp.ge.u32.totalorder %v2618_v17, 429496729  ;;  %vm1410_vm8 = vcmp.eq.s32.totalorder %v2259_v54, %v1328_v57  ;;  %vm1408_vm10 = vcmp.eq.s32.totalorder %v2259_v54, %v2652_v1 }
  0xef   :  { %916 = vst [vmem:[#allocation4 + $0xc8] sm:$0xff] %v2747_v14  ;;  %vm808_vm4 = vcmp.ge.u32.totalorder %v2676_v53, 429496729  ;;  %vm823_vm5 = vcmp.ge.u32.totalorder %v2680_v48, 429496729  ;;  %v2762_v34 = vsel %vm809_vm15, %v841_v58, 0.0  ;;  %1534 = vadd.xlane.f32.xlu0 %v1501_v19  ;;  %vm1409_vm11 = vcmp.eq.s32.totalorder %v2259_v54, %v2710_v22 }
  0xf0   :  { %v856_v24 = vmul.f32 1.1111112, %v360_v11  ;;  %v2766_v35 = vsel %vm810_vm0, %v842_v0, 0.0  ;;  %v2770_v45 = vsel %vm825_vm1, %v857_v20, 0.0  ;;  %v2775_v5 = vsel %vm923_vm7, %v2602_v2, -1e+30 }
  0xf1   :  { %905 = vst [vmem:[#allocation4 + $0x70] sm:$0xff] %v2762_v34  ;;  %906 = vst [vmem:[#allocation4 + $0x78] sm:$0xff] %v2766_v35  ;;  %vm824_vm6 = vcmp.ge.u32.totalorder %v792_v51, 429496729  ;;  %1002 = vmax.xlane.f32.xlu1 %v2775_v5  ;;  %v2783_v49 = vsel %vm826_vm2, %v858_v63, 0.0  ;;  %v2787_v50 = vsel %vm807_vm3, %v839_v41, 0.0  ;;  %v1331_v48 = vpop.permute.xlu1 %1330 }
  0xf2   :  { %921 = vst [vmem:[#allocation4 + $0xf0] sm:$0xff] %v2770_v45  ;;  %v2791_v10 = vsel %vm808_vm4, %v840_v4, 0.0  ;;  %v2795_v2 = vsel %vm823_vm5, %v855_v25, 0.0  ;;  %922 = vst [vmem:[#allocation4 + $0xf8] sm:$0xff] %v2783_v49  ;;  %v2801_v8 = vsel %vm824_vm6, %v856_v24, 0.0  ;;  %vm1411_vm9 = vcmp.eq.s32.totalorder %v2259_v54, %v1331_v48 }
  0xf3   :  { %903 = vst [vmem:[#allocation4 + $0x60] sm:$0xff] %v2787_v50  ;;  %904 = vst [vmem:[#allocation4 + $0x68] sm:$0xff] %v2791_v10  ;;  %v2806_v17 = vsel %vm923_vm7, %v2638_v9, -1e+30  ;;  %v2811_v53 = vsel %vm923_vm7, %v2642_v36, -1e+30 }
  0xf4   :  { %919 = vst [vmem:[#allocation4 + $0xe0] sm:$0xff] %v2795_v2  ;;  %920 = vst [vmem:[#allocation4 + $0xe8] sm:$0xff] %v2801_v8  ;;  %964 = vmax.xlane.f32.xlu0 %v2806_v17  ;;  %v2821_v9 = vsel %vm923_vm7, %v2646_v56, -1e+30  ;;  %v2826_v36 = vsel %vm923_vm7, %v2650_v40, -1e+30 }
  0xf5   :  { %966 = vmax.xlane.f32.xlu1 %v2811_v53  ;;  %v1786_v31 = vsel %vm1410_vm8, 1.0, %v3507_v61  ;;  %v1787_v33 = vsel %vm1411_vm9, 1.0, %v3507_v61  ;;  %v1784_v40 = vsel %vm1408_vm10, 1.0, %v3507_v61  ;;  %v1785_v43 = vsel %vm1409_vm11, 1.0, %v3507_v61 }
  0xf6   :  { %v1506_v56 = vmul.f32 %v1786_v31, %v2689_v30  ;;  %v1507_v7 = vmul.f32 %v1787_v33, %v2727_v28  ;;  %v1504_v18 = vmul.f32 %v1784_v40, %v2806_v17  ;;  %v1505_v38 = vmul.f32 %v1785_v43, %v2811_v53 }
  0xf7   :  { %v2845_v1 = vsel %vm923_vm7, %v2693_v52, -1e+30  ;;  %v2850_v23 = vsel %vm923_vm7, %v2700_v15, -1e+30  ;;  %v2857_v22 = vsel %vm923_vm7, %v2704_v13, -1e+30  ;;  %v1337_v52 = vpop.permute.xlu0 %1336 }
  0xf8   :  { %996 = vmax.xlane.f32.xlu0 %v2821_v9  ;;  %v2862_v29 = vsel %vm923_vm7, %v2708_v37, -1e+30  ;;  %v2869_v15 = vsel %vm923_vm7, %v2735_v26, -1e+30  ;;  %v2874_v13 = vsel %vm923_vm7, %v2739_v21, -1e+30  ;;  %v1334_v37 = vpop.permute.xlu1 %1333  ;;  %vm1413_vm13 = vcmp.eq.s32.totalorder %v2259_v54, %v1337_v52 }
  0xf9   :  { %998 = vmax.xlane.f32.xlu1 %v2826_v36  ;;  %vm1412_vm12 = vcmp.eq.s32.totalorder %v2259_v54, %v1334_v37  ;;  %v2883_v44 = vsel %vm923_vm7, %v2743_v12, -1e+30  ;;  %v2888_v58 = vsel %vm923_vm7, %v2747_v14, -1e+30  ;;  %v1789_v16 = vsel %vm1413_vm13, 1.0, %v3507_v61 }
  0xfa   :  { %v1788_v20 = vsel %vm1412_vm12, 1.0, %v3507_v61  ;;  %v1509_v51 = vmul.f32 %v1789_v16, %v2874_v13  ;;  %v2901_v60 = vsel %vm923_vm7, %v2762_v34, -1e+30  ;;  %v2906_v11 = vsel %vm923_vm7, %v2766_v35, -1e+30 }
  0xfb   :  { %v1343_v47 = vpop.permute.xlu0 %1342  ;;  %v1508_v59 = vmul.f32 %v1788_v20, %v2869_v15  ;;  %v2913_v21 = vsel %vm923_vm7, %v2770_v45, -1e+30  ;;  %v2918_v12 = vsel %vm923_vm7, %v2783_v49, -1e+30  ;;  %v2925_v25 = vsel %vm923_vm7, %v2787_v50, -1e+30 }
  0xfc   :  { %1544 = vadd.xlane.f32.xlu0 %v1506_v56  ;;  %v1340_v0 = vpop.permute.xlu1 %1339  ;;  %v2930_v63 = vsel %vm923_vm7, %v2791_v10, -1e+30  ;;  %vm1415_vm15 = vcmp.eq.s32.totalorder %v2259_v54, %v1343_v47  ;;  %v2939_v24 = vsel %vm923_vm7, %v2795_v2, -1e+30  ;;  %v2944_v34 = vsel %vm923_vm7, %v2801_v8, -1e+30 }
  0xfd   :  { %1546 = vadd.xlane.f32.xlu1 %v1507_v7  ;;  %vm1414_vm14 = vcmp.eq.s32.totalorder %v2259_v54, %v1340_v0  ;;  %v1791_v45 = vsel %vm1415_vm15, 1.0, %v3507_v61 }
  0xfe   :  { %v1790_v35 = vsel %vm1414_vm14, 1.0, %v3507_v61  ;;  %v1511_v49 = vmul.f32 %v1791_v45, %v2850_v23 }
  0xff   :  { %v2896_v41 = vpop.permute.xlu0 %1348  ;;  %v1510_v57 = vmul.f32 %v1790_v35, %v2845_v1 }
 0x100   :  { %1540 = vadd.xlane.f32.xlu0 %v1504_v18  ;;  %v1346_v14 = vpop.permute.xlu1 %1345  ;;  %vm1417_vm8 = vcmp.eq.s32.totalorder %v2259_v54, %v2896_v41 }
 0x101   :  { %1542 = vadd.xlane.f32.xlu1 %v1505_v38  ;;  %vm1416_vm1 = vcmp.eq.s32.totalorder %v2259_v54, %v1346_v14  ;;  %v1793_v14 = vsel %vm1417_vm8, 1.0, %v3507_v61 }
 0x102   :  { %v1792_v8 = vsel %vm1416_vm1, 1.0, %v3507_v61 }
 0x103   :  { %v1355_v26 = vpop.permute.xlu0 %1354  ;;  %v1512_v48 = vmul.f32 %v1792_v8, %v2925_v25 }
 0x104   :  { %976 = vmax.xlane.f32.xlu0 %v2845_v1  ;;  %v1352_v19 = vpop.permute.xlu1 %1351  ;;  %vm1419_vm6 = vcmp.eq.s32.totalorder %v2259_v54, %v1355_v26 }
 0x105   :  { %978 = vmax.xlane.f32.xlu1 %v2850_v23  ;;  %vm1418_vm2 = vcmp.eq.s32.totalorder %v2259_v54, %v1352_v19  ;;  %v1513_v19 = vmul.f32 %v1793_v14, %v2930_v63 }
 0x106   :  { %v1794_v7 = vsel %vm1418_vm2, 1.0, %v3507_v61 }
 0x107   :  { %v1361_v4 = vpop.permute.xlu0 %1360  ;;  %v1514_v40 = vmul.f32 %v1794_v7, %v2901_v60 }
 0x108   :  { %1008 = vmax.xlane.f32.xlu0 %v2857_v22  ;;  %vm1421_vm0 = vcmp.eq.s32.totalorder %v2259_v54, %v1361_v4  ;;  %v1358_v2 = vpop.permute.xlu1 %1357 }
 0x109   :  { %1010 = vmax.xlane.f32.xlu1 %v2862_v29  ;;  %v1797_v10 = vsel %vm1421_vm0, 1.0, %v3507_v61  ;;  %vm1420_vm3 = vcmp.eq.s32.totalorder %v2259_v54, %v1358_v2 }
 0x10a   :  { %v1517_v31 = vmul.f32 %v1797_v10, %v2660_v3  ;;  %v1796_v38 = vsel %vm1420_vm3, 1.0, %v3507_v61 }
 0x10b   :  { %v1367_v50 = vpop.permute.xlu0 %1366  ;;  %v1516_v37 = vmul.f32 %v1796_v38, %v2579_v39 }
 0x10c   :  { %972 = vmax.xlane.f32.xlu0 %v2869_v15  ;;  %vm1423_vm7 = vcmp.eq.s32.totalorder %v2259_v54, %v1367_v50  ;;  %v1364_v18 = vpop.permute.xlu1 %1363 }
 0x10d   :  { %974 = vmax.xlane.f32.xlu1 %v2874_v13  ;;  %v1799_v33 = vsel %vm1423_vm7, 1.0, %v3507_v61  ;;  %vm1422_vm5 = vcmp.eq.s32.totalorder %v2259_v54, %v1364_v18 }
 0x10e   :  { %v1519_v43 = vmul.f32 %v1799_v33, %v2575_v32  ;;  %v1798_v20 = vsel %vm1422_vm5, 1.0, %v3507_v61 }
 0x10f   :  { %v1373_v56 = vpop.permute.xlu0 %1372 }
 0x110   :  { %1004 = vmax.xlane.f32.xlu0 %v2883_v44  ;;  %vm1425_vm4 = vcmp.eq.s32.totalorder %v2259_v54, %v1373_v56  ;;  %v1370_v16 = vpop.permute.xlu1 %1369 }
 0x111   :  { %1006 = vmax.xlane.f32.xlu1 %v2888_v58  ;;  %v1801_v52 = vsel %vm1425_vm4, 1.0, %v3507_v61  ;;  %vm1424_vm9 = vcmp.eq.s32.totalorder %v2259_v54, %v1370_v16 }
 0x112   :  { %v1521_v47 = vmul.f32 %v1801_v52, %v2826_v36  ;;  %v1800_v26 = vsel %vm1424_vm9, 1.0, %v3507_v61 }
 0x113   :  { %v1520_v4 = vmul.f32 %v1800_v26, %v2821_v9  ;;  %v2985_v41 = vpop.permute.xlu0 %1378 }
 0x114   :  { %1548 = vadd.xlane.f32.xlu0 %v1508_v59  ;;  %v1795_v59 = vsel %vm1419_vm6, 1.0, %v3507_v61  ;;  %v2983_v35 = vpop.permute.xlu1 %1375  ;;  %vm1427_vm11 = vcmp.eq.s32.totalorder %v2259_v54, %v2985_v41 }
 0x115   :  { %1550 = vadd.xlane.f32.xlu1 %v1509_v51  ;;  %v1518_v51 = vmul.f32 %v1798_v20, %v2503_v27  ;;  %v1515_v0 = vmul.f32 %v1795_v59, %v2906_v11  ;;  %vm1426_vm10 = vcmp.eq.s32.totalorder %v2259_v54, %v2983_v35 }
 0x118   :  { %984 = vmax.xlane.f32.xlu0 %v2901_v60  ;;  %v2987_v45 = vpop.permute.xlu1 %1381 }
 0x119   :  { %986 = vmax.xlane.f32.xlu1 %v2906_v11  ;;  %vm1428_vm12 = vcmp.eq.s32.totalorder %v2259_v54, %v2987_v45 }
 0x11c   :  { %1016 = vmax.xlane.f32.xlu0 %v2913_v21 }
 0x11d   :  { %1018 = vmax.xlane.f32.xlu1 %v2918_v12 }
 0x120   :  { %980 = vmax.xlane.f32.xlu0 %v2925_v25 }
 0x121   :  { %982 = vmax.xlane.f32.xlu1 %v2930_v63 }
 0x124   :  { %1012 = vmax.xlane.f32.xlu0 %v2939_v24 }
 0x125   :  { %1014 = vmax.xlane.f32.xlu1 %v2944_v34 }
 0x128   :  { %1552 = vadd.xlane.f32.xlu0 %v1510_v57  ;;  %v2989_v57 = vpop.permute.xlu0 %1384 }
 0x129   :  { %1554 = vadd.xlane.f32.xlu1 %v1511_v49  ;;  %v2991_v49 = vpop.permute.xlu1 %1387  ;;  %vm1429_vm13 = vcmp.eq.s32.totalorder %v2259_v54, %v2989_v57 }
 0x12a   :  { %vm1430_vm14 = vcmp.eq.s32.totalorder %v2259_v54, %v2991_v49 }
 0x12c   :  { %1556 = vadd.xlane.f32.xlu0 %v1512_v48  ;;  %v2993_v50 = vpop.permute.xlu0 %1390 }
 0x12d   :  { %1566 = vadd.xlane.f32.xlu1 %v1517_v31  ;;  %v2995_v10 = vpop.permute.xlu1 %1393  ;;  %vm1431_vm15 = vcmp.eq.s32.totalorder %v2259_v54, %v2993_v50 }
 0x12e   :  { %vm1432_vm0 = vcmp.eq.s32.totalorder %v2259_v54, %v2995_v10 }
 0x130   :  { %1560 = vadd.xlane.f32.xlu0 %v1514_v40  ;;  %v2997_v2 = vpop.permute.xlu0 %1396 }
 0x131   :  { %1570 = vadd.xlane.f32.xlu1 %v1519_v43  ;;  %v2999_v8 = vpop.permute.xlu1 %1399  ;;  %vm1433_vm1 = vcmp.eq.s32.totalorder %v2259_v54, %v2997_v2 }
 0x132   :  { %vm1434_vm7 = vcmp.eq.s32.totalorder %v2259_v54, %v2999_v8 }
 0x134   :  { %1564 = vadd.xlane.f32.xlu0 %v1516_v37  ;;  %v3001_v48 = vpop.permute.xlu0 %1402 }
 0x135   :  { %1574 = vadd.xlane.f32.xlu1 %v1521_v47  ;;  %vm1435_vm2 = vcmp.eq.s32.totalorder %v2259_v54, %v3001_v48 }
 0x138   :  { %1568 = vadd.xlane.f32.xlu0 %v1518_v51 }
 0x139   :  { %1562 = vadd.xlane.f32.xlu1 %v1515_v0 }
 0x13c   :  { %1572 = vadd.xlane.f32.xlu0 %v1520_v4 }
 0x13d   :  { %1558 = vadd.xlane.f32.xlu1 %v1513_v19 }
 0x15c   :  { %v3003_v31 = vpop.xlane.xlu0 %992  ;;  %v3005_v33 = vpop.xlane.xlu1 %960 }
 0x15d   :  { %v1022_v56 = vsub.f32 %v2507_v62, %v3005_v33  ;;  %v1038_v7 = vsub.f32 %v2503_v27, %v3003_v31 }
 0x15f   :  { %v1056_v40 = vmul.f32 1.442695, %v1022_v56  ;;  %v1088_v52 = vmul.f32 1.442695, %v1038_v7 }
 0x160   :  { %v3011_v43 = vpop.xlane.xlu1 %962  ;;  %v3013_v18 = vpop.xlane.xlu0 %956 }
 0x161   :  { %v1023_v38 = vsub.f32 %v2544_v42, %v3011_v43  ;;  %1895 = vpow2.f32 %v1056_v40  ;;  %v1020_v37 = vsub.f32 %v2548_v46, %v3013_v18 }
 0x163   :  { %v1058_v47 = vmul.f32 1.442695, %v1023_v38  ;;  %v1052_v16 = vmul.f32 1.442695, %v1020_v37 }
 0x164   :  { %v3019_v20 = vpop.xlane.xlu1 %994  ;;  %v3021_v62 = vpop.xlane.xlu0 %988 }
 0x165   :  { %1897 = vpow2.f32 %v1058_v47  ;;  %v1039_v27 = vsub.f32 %v2575_v32, %v3019_v20  ;;  %v1036_v59 = vsub.f32 %v2579_v39, %v3021_v62 }
 0x166   :  { %1899 = vpow2.f32 %v1088_v52 }
 0x167   :  { %v1090_v42 = vmul.f32 1.442695, %v1039_v27  ;;  %v1084_v46 = vmul.f32 1.442695, %v1036_v59 }
 0x168   :  { %v3027_v51 = vpop.xlane.xlu0 %1536  ;;  %v3029_v0 = vpop.xlane.xlu1 %1532 }
 0x169   :  { %1901 = vpow2.f32 %v1090_v42 }
 0x16a   :  { %1903 = vpow2.f32 %v1052_v16 }
 0x16b   :  { %1905 = vpow2.f32 %v1084_v46 }
 0x16c   :  { %v3031_v26 = vpop.xlane.xlu0 %958  ;;  %v3033_v14 = vpop.xlane.xlu1 %990 }
 0x16d   :  { %v1021_v32 = vsub.f32 %v2630_v6, %v3031_v26  ;;  %v1037_v4 = vsub.f32 %v2660_v3, %v3033_v14 }
 0x16e   :  { %v1896_v39 = vpop.eup %1895 }
 0x16f   :  { %v1054_v19 = vmul.f32 1.442695, %v1021_v32  ;;  %v1086_v56 = vmul.f32 1.442695, %v1037_v4  ;;  %1120 = vadd.xlane.f32.xlu0 %v1896_v39 }
 0x170   :  { %v3039_v7 = vpop.xlane.xlu0 %968  ;;  %v3041_v40 = vpop.xlane.xlu1 %1538 }
 0x171   :  { %1907 = vpow2.f32 %v1054_v19  ;;  %v1026_v38 = vsub.f32 %v2689_v30, %v3039_v7 }
 0x172   :  { %v1898_v52 = vpop.eup %1897  ;;  %1909 = vpow2.f32 %v1086_v56 }
 0x173   :  { %v1900_v37 = vpop.eup %1899  ;;  %v1064_v47 = vmul.f32 1.442695, %v1026_v38  ;;  %1122 = vadd.xlane.f32.xlu1 %v1898_v52 }
 0x174   :  { %1152 = vadd.xlane.f32.xlu0 %v1900_v37  ;;  %v3045_v6 = vpop.xlane.xlu0 %1000 }
 0x175   :  { %3520 = vst [vmem:[#allocation7_spill] sm:$0xff] %v3045_v6  ;;  %v3047_v3 = vpop.xlane.xlu1 %970  ;;  %1911 = vpow2.f32 %v1064_v47  ;;  %v1042_v27 = vsub.f32 %v2719_v55, %v3045_v6 }
 0x176   :  { %v1027_v16 = vsub.f32 %v2727_v28, %v3047_v3  ;;  %v1902_v59 = vpop.eup %1901 }
 0x177   :  { %v1904_v42 = vpop.eup %1903  ;;  %v1096_v30 = vmul.f32 1.442695, %v1042_v27  ;;  %1154 = vadd.xlane.f32.xlu1 %v1902_v59 }
 0x178   :  { %v1066_v46 = vmul.f32 1.442695, %v1027_v16  ;;  %1116 = vadd.xlane.f32.xlu0 %v1904_v42  ;;  %v3053_v32 = vpop.xlane.xlu0 %1534  ;;  %v1906_v19 = vpop.eup %1905 }
 0x179   :  { %1913 = vpow2.f32 %v1096_v30 }
 0x17a   :  { %v3055_v4 = vpop.xlane.xlu1 %1002  ;;  %1915 = vpow2.f32 %v1066_v46 }
 0x17b   :  { %3521 = vst [vmem:[#allocation8_spill] sm:$0xff] %v3055_v4  ;;  %v1043_v39 = vsub.f32 %v2775_v5, %v3055_v4 }
 0x17c   :  { %1148 = vadd.xlane.f32.xlu0 %v1906_v19 }
 0x17d   :  { %v1098_v56 = vmul.f32 1.442695, %v1043_v39  ;;  %v3059_v38 = vpop.xlane.xlu0 %964 }
 0x17e   :  { %v3061_v28 = vpop.xlane.xlu1 %966  ;;  %v1024_v52 = vsub.f32 %v2806_v17, %v3059_v38  ;;  %v1908_v47 = vpop.eup %1907 }
 0x17f   :  { %1917 = vpow2.f32 %v1098_v56  ;;  %v1025_v37 = vsub.f32 %v2811_v53, %v3061_v28  ;;  %1118 = vadd.xlane.f32.xlu1 %v1908_v47  ;;  %v1910_v30 = vpop.eup %1909 }
 0x180   :  { %v1060_v27 = vmul.f32 1.442695, %v1024_v52 }
 0x181   :  { %v1062_v16 = vmul.f32 1.442695, %v1025_v37  ;;  %v3067_v59 = vpop.xlane.xlu0 %996 }
 0x182   :  { %v3069_v42 = vpop.xlane.xlu1 %998  ;;  %1919 = vpow2.f32 %v1060_v27  ;;  %v1040_v46 = vsub.f32 %v2821_v9, %v3067_v59  ;;  %v1912_v17 = vpop.eup %1911 }
 0x183   :  { %v1041_v39 = vsub.f32 %v2826_v36, %v3069_v42  ;;  %1921 = vpow2.f32 %v1062_v16  ;;  %1128 = vadd.xlane.f32.xlu0 %v1912_v17  ;;  %1150 = vadd.xlane.f32.xlu1 %v1910_v30 }
 0x184   :  { %v1092_v19 = vmul.f32 1.442695, %v1040_v46 }
 0x185   :  { %v1094_v53 = vmul.f32 1.442695, %v1041_v39  ;;  %v3075_v56 = vpop.xlane.xlu0 %1544 }
 0x186   :  { %v3077_v52 = vpop.xlane.xlu1 %1546  ;;  %1923 = vpow2.f32 %v1092_v19  ;;  %v1914_v37 = vpop.eup %1913 }
 0x187   :  { %1925 = vpow2.f32 %v1094_v53  ;;  %v1916_v47 = vpop.eup %1915  ;;  %1160 = vadd.xlane.f32.xlu0 %v1914_v37 }
 0x188   :  { %1130 = vadd.xlane.f32.xlu1 %v1916_v47 }
 0x189   :  { %v3079_v9 = vpop.xlane.xlu0 %1540 }
 0x18a   :  { %v3081_v27 = vpop.xlane.xlu1 %1542 }
 0x18c   :  { %v1918_v36 = vpop.eup %1917 }
 0x18d   :  { %1162 = vadd.xlane.f32.xlu1 %v1918_v36  ;;  %v3083_v16 = vpop.xlane.xlu0 %976 }
 0x18e   :  { %v3085_v46 = vpop.xlane.xlu1 %978  ;;  %v1030_v30 = vsub.f32 %v2845_v1, %v3083_v16 }
 0x18f   :  { %3522 = vst [vmem:[#allocation9_spill] sm:$0xff] %v3085_v46  ;;  %v1031_v39 = vsub.f32 %v2850_v23, %v3085_v46  ;;  %v1920_v17 = vpop.eup %1919 }
 0x190   :  { %v1922_v19 = vpop.eup %1921  ;;  %v1072_v53 = vmul.f32 1.442695, %v1030_v30  ;;  %1124 = vadd.xlane.f32.xlu0 %v1920_v17 }
 0x191   :  { %v1074_v37 = vmul.f32 1.442695, %v1031_v39  ;;  %1126 = vadd.xlane.f32.xlu1 %v1922_v19  ;;  %v3091_v47 = vpop.xlane.xlu0 %1008 }
 0x192   :  { %3523 = vst [vmem:[#allocation10_spill] sm:$0xff] %v3091_v47  ;;  %v3093_v61 = vpop.xlane.xlu1 %1010  ;;  %1927 = vpow2.f32 %v1072_v53  ;;  %v1046_v36 = vsub.f32 %v2857_v22, %v3091_v47 }
 0x193   :  { %3524 = vst [vmem:[#allocation11_spill] sm:$0xff] %v3093_v61  ;;  %v1047_v1 = vsub.f32 %v2862_v29, %v3093_v61  ;;  %v1924_v4 = vpop.eup %1923  ;;  %1929 = vpow2.f32 %v1074_v37 }
 0x194   :  { %v1926_v23 = vpop.eup %1925  ;;  %v1104_v6 = vmul.f32 1.442695, %v1046_v36  ;;  %1156 = vadd.xlane.f32.xlu0 %v1924_v4 }
 0x195   :  { %v1106_v46 = vmul.f32 1.442695, %v1047_v1  ;;  %1158 = vadd.xlane.f32.xlu1 %v1926_v23  ;;  %v3099_v30 = vpop.xlane.xlu0 %972 }
 0x196   :  { %v3101_v39 = vpop.xlane.xlu1 %974  ;;  %1931 = vpow2.f32 %v1104_v6  ;;  %v1028_v17 = vsub.f32 %v2869_v15, %v3099_v30 }
 0x197   :  { %v1029_v19 = vsub.f32 %v2874_v13, %v3101_v39  ;;  %1933 = vpow2.f32 %v1106_v46 }
 0x198   :  { %v1068_v53 = vmul.f32 1.442695, %v1028_v17 }
 0x199   :  { %v1070_v61 = vmul.f32 1.442695, %v1029_v19  ;;  %v3107_v37 = vpop.xlane.xlu0 %1004 }
 0x19a   :  { %3525 = vst [vmem:[#allocation12_spill] sm:$0xff] %v3107_v37  ;;  %v3109_v36 = vpop.xlane.xlu1 %1006  ;;  %1935 = vpow2.f32 %v1068_v53  ;;  %v1044_v4 = vsub.f32 %v2883_v44, %v3107_v37 }
 0x19b   :  { %3526 = vst [vmem:[#allocation13_spill] sm:$0xff] %v3109_v36  ;;  %v1045_v6 = vsub.f32 %v2888_v58, %v3109_v36  ;;  %1937 = vpow2.f32 %v1070_v61 }
 0x19c   :  { %v1100_v1 = vmul.f32 1.442695, %v1044_v4 }
 0x19d   :  { %v1102_v15 = vmul.f32 1.442695, %v1045_v6  ;;  %v3115_v23 = vpop.xlane.xlu0 %1548 }
 0x19e   :  { %v3117_v13 = vpop.xlane.xlu1 %1550  ;;  %1939 = vpow2.f32 %v1100_v1 }
 0x19f   :  { %v1928_v46 = vpop.eup %1927  ;;  %1941 = vpow2.f32 %v1102_v15 }
 0x1a0   :  { %v1930_v17 = vpop.eup %1929  ;;  %1136 = vadd.xlane.f32.xlu0 %v1928_v46 }
 0x1a1   :  { %1138 = vadd.xlane.f32.xlu1 %v1930_v17  ;;  %v3119_v19 = vpop.xlane.xlu0 %984 }
 0x1a2   :  { %3527 = vst [vmem:[#allocation14_spill] sm:$0xff] %v3119_v19  ;;  %v3121_v53 = vpop.xlane.xlu1 %986  ;;  %v1034_v47 = vsub.f32 %v2901_v60, %v3119_v19 }
 0x1a3   :  { %3528 = vst [vmem:[#allocation15_spill] sm:$0xff] %v3121_v53  ;;  %v1035_v61 = vsub.f32 %v2906_v11, %v3121_v53  ;;  %v1932_v4 = vpop.eup %1931 }
 0x1a4   :  { %v1934_v6 = vpop.eup %1933  ;;  %v1080_v36 = vmul.f32 1.442695, %v1034_v47  ;;  %1168 = vadd.xlane.f32.xlu0 %v1932_v4 }
 0x1a5   :  { %v1082_v37 = vmul.f32 1.442695, %v1035_v61  ;;  %1170 = vadd.xlane.f32.xlu1 %v1934_v6  ;;  %v3127_v1 = vpop.xlane.xlu0 %1016 }
 0x1a6   :  { %3529 = vst [vmem:[#allocation16_spill] sm:$0xff] %v3127_v1  ;;  %v3129_v15 = vpop.xlane.xlu1 %1018  ;;  %1943 = vpow2.f32 %v1080_v36  ;;  %v1050_v46 = vsub.f32 %v2913_v21, %v3127_v1 }
 0x1a7   :  { %3530 = vst [vmem:[#allocation17_spill] sm:$0xff] %v3129_v15  ;;  %v1051_v60 = vsub.f32 %v2918_v12, %v3129_v15  ;;  %v1936_v17 = vpop.eup %1935  ;;  %1945 = vpow2.f32 %v1082_v37 }
 0x1a8   :  { %v1938_v11 = vpop.eup %1937  ;;  %v1112_v53 = vmul.f32 1.442695, %v1050_v46  ;;  %1132 = vadd.xlane.f32.xlu0 %v1936_v17 }
 0x1a9   :  { %v1114_v19 = vmul.f32 1.442695, %v1051_v60  ;;  %1134 = vadd.xlane.f32.xlu1 %v1938_v11  ;;  %v3135_v47 = vpop.xlane.xlu0 %980 }
 0x1aa   :  { %v3137_v61 = vpop.xlane.xlu1 %982  ;;  %1947 = vpow2.f32 %v1112_v53  ;;  %v1032_v36 = vsub.f32 %v2925_v25, %v3135_v47 }
 0x1ab   :  { %v1033_v4 = vsub.f32 %v2930_v63, %v3137_v61  ;;  %v1940_v6 = vpop.eup %1939  ;;  %1949 = vpow2.f32 %v1114_v19 }
 0x1ac   :  { %v1942_v15 = vpop.eup %1941  ;;  %v1076_v37 = vmul.f32 1.442695, %v1032_v36  ;;  %1164 = vadd.xlane.f32.xlu0 %v1940_v6 }
 0x1ad   :  { %v1078_v1 = vmul.f32 1.442695, %v1033_v4  ;;  %1166 = vadd.xlane.f32.xlu1 %v1942_v15  ;;  %v3143_v46 = vpop.xlane.xlu0 %1012 }
 0x1ae   :  { %v3145_v60 = vpop.xlane.xlu1 %1014  ;;  %1951 = vpow2.f32 %v1076_v37  ;;  %v1048_v53 = vsub.f32 %v2939_v24, %v3143_v46 }
 0x1af   :  { %v1049_v25 = vsub.f32 %v2944_v34, %v3145_v60  ;;  %1953 = vpow2.f32 %v1078_v1 }
 0x1b0   :  { %v1108_v63 = vmul.f32 1.442695, %v1048_v53  ;;  %v3531_v53 = vmov 0.0  }
 0x1b1   :  { %v1110_v17 = vmul.f32 1.442695, %v1049_v25  ;;  %v1802_v25 = vsel %vm1426_vm10, 1.0, %v3531_v53  ;;  %v1804_v41 = vsel %vm1428_vm12, 1.0, %v3531_v53  ;;  %v1806_v57 = vsel %vm1430_vm14, 1.0, %v3531_v53  ;;  %v3191_v8 = vpop.xlane.xlu0 %1552 }
 0x1b2   :  { %1955 = vpow2.f32 %v1108_v63  ;;  %v1803_v63 = vsel %vm1427_vm11, 1.0, %v3531_v53  ;;  %v1524_v45 = vmul.f32 %v1804_v41, %v2883_v44  ;;  %v1526_v49 = vmul.f32 %v1806_v57, %v2857_v22 }
 0x1b3   :  { %v1944_v19 = vpop.eup %1943  ;;  %1957 = vpow2.f32 %v1110_v17  ;;  %v1522_v17 = vmul.f32 %v1802_v25, %v2719_v55  ;;  %v1523_v35 = vmul.f32 %v1803_v63, %v2775_v5  ;;  %v1807_v5 = vsel %vm1431_vm15, 1.0, %v3531_v53 }
 0x1b4   :  { %v1946_v11 = vpop.eup %1945  ;;  %1144 = vadd.xlane.f32.xlu0 %v1944_v19  ;;  %v1805_v19 = vsel %vm1429_vm13, 1.0, %v3531_v53  ;;  %v1527_v44 = vmul.f32 %v1807_v5, %v2862_v29  ;;  %v1808_v50 = vsel %vm1432_vm0, 1.0, %v3531_v53  ;;  %v1810_v2 = vsel %vm1434_vm7, 1.0, %v3531_v53 }
 0x1b5   :  { %1146 = vadd.xlane.f32.xlu1 %v1946_v11  ;;  %v1525_v55 = vmul.f32 %v1805_v19, %v2888_v58  ;;  %v1809_v58 = vsel %vm1433_vm1, 1.0, %v3531_v53  ;;  %v1528_v10 = vmul.f32 %v1808_v50, %v2939_v24  ;;  %v1811_v29 = vsel %vm1435_vm2, 1.0, %v3531_v53  ;;  %v3193_v24 = vpop.xlane.xlu1 %1554 }
 0x1b6   :  { %v1529_v22 = vmul.f32 %v1809_v58, %v2944_v34  ;;  %v1530_v11 = vmul.f32 %v1810_v2, %v2913_v21 }
 0x1b7   :  { %v1948_v15 = vpop.eup %1947 }
 0x1b8   :  { %v1950_v36 = vpop.eup %1949  ;;  %1176 = vadd.xlane.f32.xlu0 %v1948_v15  ;;  %v1531_v15 = vmul.f32 %v1811_v29, %v2918_v12 }
 0x1b9   :  { %1178 = vadd.xlane.f32.xlu1 %v1950_v36  ;;  %v3195_v36 = vpop.xlane.xlu0 %1556  ;;  %v3197_v54 = vpop.xlane.xlu1 %1566 }
 0x1bb   :  { %v1952_v4 = vpop.eup %1951 }
 0x1bc   :  { %v1954_v6 = vpop.eup %1953  ;;  %1140 = vadd.xlane.f32.xlu0 %v1952_v4 }
 0x1bd   :  { %1142 = vadd.xlane.f32.xlu1 %v1954_v6  ;;  %v3199_v34 = vpop.xlane.xlu0 %1560 }
 0x1bf   :  { %v1956_v1 = vpop.eup %1955 }
 0x1c0   :  { %v1958_v37 = vpop.eup %1957  ;;  %1172 = vadd.xlane.f32.xlu0 %v1956_v1 }
 0x1c1   :  { %1174 = vadd.xlane.f32.xlu1 %v1958_v37 }
 0x1c4   :  { %1576 = vadd.xlane.f32.xlu0 %v1522_v17 }
 0x1c5   :  { %1578 = vadd.xlane.f32.xlu1 %v1523_v35 }
 0x1c8   :  { %1580 = vadd.xlane.f32.xlu0 %v1524_v45 }
 0x1c9   :  { %1582 = vadd.xlane.f32.xlu1 %v1525_v55 }
 0x1cc   :  { %1584 = vadd.xlane.f32.xlu0 %v1526_v49 }
 0x1cd   :  { %1586 = vadd.xlane.f32.xlu1 %v1527_v44 }
 0x1d0   :  { %1588 = vadd.xlane.f32.xlu0 %v1528_v10 }
 0x1d1   :  { %1590 = vadd.xlane.f32.xlu1 %v1529_v22 }
 0x1d4   :  { %1592 = vadd.xlane.f32.xlu0 %v1530_v11 }
 0x1d5   :  { %1594 = vadd.xlane.f32.xlu1 %v1531_v15 }
 0x1d6   :  { %2034 = shalt.err (!%p2031_p4)
}
 0x1d7   :  { %s2048_s8 = smov 128   ;;  %s2049_s9 = smov 8   ;;  %v3204_v21 = vpop.xlane.xlu1 %1570  ;;  %v3206_v12 = vpop.xlane.xlu0 %1564  ;;  %v1598_v44 = vld [vmem:[%s3504_s5 + $0x10] sm:$0xff]  ;;  %vm1692_vm3 = vcmask 7168  }
 0x1d8   :  { %1736 = dma.vmem_to_hbm [thread:$0]  %s1731_s29, 4096, %s3505_s6, [#allocation5], %s2048_s8, %s2048_s8, %s2049_s9  }
 0x1db   :  { %v3208_v48 = vpop.xlane.xlu1 %1574  ;;  %v1569_v4 = vpop.xlane.xlu0 %1568 }
 0x1df   :  { %v3210_v6 = vpop.xlane.xlu1 %1562  ;;  %v3212_v1 = vpop.xlane.xlu0 %1572 }
 0x1e3   :  { %v3214_v37 = vpop.xlane.xlu1 %1558 }
 0x1f8   :  { %v1121_v53 = vpop.xlane.xlu0 %1120 }
 0x1f9   :  { %1959 = vlog2.f32 %v1121_v53 }
 0x1fc   :  { %v1123_v25 = vpop.xlane.xlu1 %1122 }
 0x1fd   :  { %v1153_v63 = vpop.xlane.xlu0 %1152  ;;  %1961 = vlog2.f32 %v1123_v25 }
 0x1fe   :  { %1963 = vlog2.f32 %v1153_v63 }
 0x200   :  { %v1155_v17 = vpop.xlane.xlu1 %1154 }
 0x201   :  { %v1117_v35 = vpop.xlane.xlu0 %1116  ;;  %1965 = vlog2.f32 %v1155_v17 }
 0x202   :  { %1967 = vlog2.f32 %v1117_v35 }
 0x205   :  { %v1149_v41 = vpop.xlane.xlu0 %1148 }
 0x206   :  { %1969 = vlog2.f32 %v1149_v41  ;;  %v1960_v19 = vpop.eup %1959 }
 0x207   :  { %v1185_v45 = vmul.f32 0.6931472, %v1960_v19 }
 0x208   :  { %v1119_v55 = vpop.xlane.xlu1 %1118 }
 0x209   :  { %1971 = vlog2.f32 %v1119_v55  ;;  %v1246_v5 = vadd.f32 %v1185_v45, %v3005_v33  ;;  %v1599_v33 = vld [vmem:[%s3504_s5 + $0x18] sm:$0xff] }
 0x20a   :  { %v1962_v57 = vpop.eup %1961 }
 0x20b   :  { %v1964_v49 = vpop.eup %1963  ;;  %v1187_v50 = vmul.f32 0.6931472, %v1962_v57  ;;  %v1630_v58 = vsub.f32 %v1246_v5, %v3027_v51  ;;  %v1614_v51 = vld [vmem:[%s3504_s5 + $0x90] sm:$0xff]  ;;  %v1615_v57 = vld [vmem:[%s3504_s5 + $0x98] sm:$0xff] }
 0x20c   :  { %v1217_v10 = vmul.f32 0.6931472, %v1964_v49  ;;  %v1129_v22 = vpop.xlane.xlu0 %1128  ;;  %v1151_v2 = vpop.xlane.xlu1 %1150 }
 0x20d   :  { %v1247_v29 = vadd.f32 %v1187_v50, %v3011_v43  ;;  %1973 = vlog2.f32 %v1129_v22  ;;  %v1662_v15 = vmul.f32 %v1630_v58, %v1598_v44 }
 0x20e   :  { %v1966_v11 = vpop.eup %1965  ;;  %v1262_v53 = vadd.f32 %v1217_v10, %v3003_v31  ;;  %1975 = vlog2.f32 %v1151_v2 }
 0x20f   :  { %v1968_v25 = vpop.eup %1967  ;;  %v1631_v63 = vsub.f32 %v1247_v29, %v3041_v40  ;;  %v1219_v17 = vmul.f32 0.6931472, %v1966_v11  ;;  %1695 = vst.msk [vmem:[%s3506_s7 + $0x10] sm:$0xff] %vm1692_vm3, %v1662_v15 }
 0x210   :  { %v1646_v43 = vsub.f32 %v1262_v53, %v1569_v4  ;;  %v1181_v31 = vmul.f32 0.6931472, %v1968_v25  ;;  %v1596_v4 = vld [vmem:[%s3504_s5] sm:$0xff]  ;;  %v3252_v49 = vpop.xlane.xlu0 %1160 }
 0x211   :  { %v1663_v35 = vmul.f32 %v1631_v63, %v1599_v33  ;;  %v1263_v41 = vadd.f32 %v1219_v17, %v3019_v20  ;;  %v1131_v19 = vpop.xlane.xlu1 %1130  ;;  %v1597_v33 = vld [vmem:[%s3504_s5 + $0x8] sm:$0xff] }
 0x212   :  { %v1678_v45 = vmul.f32 %v1646_v43, %v1614_v51  ;;  %v1244_v55 = vadd.f32 %v1181_v31, %v3013_v18  ;;  %1977 = vlog2.f32 %v1131_v19 }
 0x213   :  { %v1970_v40 = vpop.eup %1969  ;;  %1696 = vst.msk [vmem:[%s3506_s7 + $0x18] sm:$0xff] %vm1692_vm3, %v1663_v35  ;;  %v1647_v20 = vsub.f32 %v1263_v41, %v3204_v21  ;;  %v1612_v21 = vld [vmem:[%s3504_s5 + $0x80] sm:$0xff]  ;;  %v1602_v35 = vld [vmem:[%s3504_s5 + $0x30] sm:$0xff] }
 0x214   :  { %1711 = vst.msk [vmem:[%s3506_s7 + $0x90] sm:$0xff] %vm1692_vm3, %v1678_v45  ;;  %v1628_v18 = vsub.f32 %v1244_v55, %v3029_v0  ;;  %v1213_v5 = vmul.f32 0.6931472, %v1970_v40 }
 0x215   :  { %v1679_v44 = vmul.f32 %v1647_v20, %v1615_v57 }
 0x216   :  { %v3254_v50 = vpop.xlane.xlu1 %1162  ;;  %v1972_v58 = vpop.eup %1971  ;;  %v1660_v10 = vmul.f32 %v1628_v18, %v1596_v4  ;;  %v1260_v22 = vadd.f32 %v1213_v5, %v3021_v62 }
 0x217   :  { %1712 = vst.msk [vmem:[%s3506_s7 + $0x98] sm:$0xff] %vm1692_vm3, %v1679_v44  ;;  %v1183_v0 = vmul.f32 0.6931472, %v1972_v58 }
 0x218   :  { %1693 = vst.msk [vmem:[%s3506_s7] sm:$0xff] %vm1692_vm3, %v1660_v10  ;;  %v1644_v2 = vsub.f32 %v1260_v22, %v3206_v12 }
 0x219   :  { %v1125_v29 = vpop.xlane.xlu0 %1124  ;;  %v1245_v62 = vadd.f32 %v1183_v0, %v3031_v26 }
 0x21a   :  { %1979 = vlog2.f32 %v1125_v29  ;;  %v1127_v11 = vpop.xlane.xlu1 %1126  ;;  %v1974_v15 = vpop.eup %1973  ;;  %v1676_v53 = vmul.f32 %v1644_v2, %v1612_v21  ;;  %v1601_v29 = vld [vmem:[%s3504_s5 + $0x28] sm:$0xff] }
 0x21b   :  { %1981 = vlog2.f32 %v1127_v11  ;;  %v1976_v25 = vpop.eup %1975  ;;  %v1629_v51 = vsub.f32 %v1245_v62, %v3053_v32  ;;  %v1193_v63 = vmul.f32 0.6931472, %v1974_v15 }
 0x21c   :  { %1709 = vst.msk [vmem:[%s3506_s7 + $0x80] sm:$0xff] %vm1692_vm3, %v1676_v53  ;;  %v1215_v12 = vmul.f32 0.6931472, %v1976_v25 }
 0x21d   :  { %v1157_v26 = vpop.xlane.xlu0 %1156  ;;  %v1661_v17 = vmul.f32 %v1629_v51, %v1597_v33  ;;  %v1250_v43 = vadd.f32 %v1193_v63, %v3039_v7  ;;  %v1613_v7 = vld [vmem:[%s3504_s5 + $0x88] sm:$0xff] }
 0x21e   :  { %1983 = vlog2.f32 %v1157_v26  ;;  %v1159_v31 = vpop.xlane.xlu1 %1158  ;;  %v1261_v41 = vadd.f32 %v1215_v12, %v3033_v14  ;;  %v1617_v63 = vld [vmem:[%s3504_s5 + $0xa8] sm:$0xff] }
 0x21f   :  { %1985 = vlog2.f32 %v1159_v31  ;;  %v1978_v32 = vpop.eup %1977  ;;  %1694 = vst.msk [vmem:[%s3506_s7 + $0x8] sm:$0xff] %vm1692_vm3, %v1661_v17  ;;  %v1634_v19 = vsub.f32 %v1250_v43, %v3075_v56  ;;  %v1603_v56 = vld [vmem:[%s3504_s5 + $0x38] sm:$0xff] }
 0x220   :  { %v1645_v45 = vsub.f32 %v1261_v41, %v3197_v54  ;;  %v1195_v55 = vmul.f32 0.6931472, %v1978_v32 }
 0x221   :  { %v1666_v57 = vmul.f32 %v1634_v19, %v1602_v35  ;;  %v1606_v19 = vld [vmem:[%s3504_s5 + $0x50] sm:$0xff] }
 0x222   :  { %v1677_v40 = vmul.f32 %v1645_v45, %v1613_v7  ;;  %v1251_v14 = vadd.f32 %v1195_v55, %v3047_v3  ;;  %v3532_v7 = vld [vmem:[#allocation9_spill] sm:$0xff] }
 0x223   :  { %1699 = vst.msk [vmem:[%s3506_s7 + $0x30] sm:$0xff] %vm1692_vm3, %v1666_v57 }
 0x224   :  { %1710 = vst.msk [vmem:[%s3506_s7 + $0x88] sm:$0xff] %vm1692_vm3, %v1677_v40  ;;  %v1635_v54 = vsub.f32 %v1251_v14, %v3077_v52  ;;  %v1600_v52 = vld [vmem:[%s3504_s5 + $0x20] sm:$0xff] }
 0x226   :  { %v1667_v20 = vmul.f32 %v1635_v54, %v1603_v56 }
 0x227   :  { %v1980_v4 = vpop.eup %1979 }
 0x228   :  { %v1982_v18 = vpop.eup %1981  ;;  %v1189_v3 = vmul.f32 0.6931472, %v1980_v4  ;;  %1700 = vst.msk [vmem:[%s3506_s7 + $0x38] sm:$0xff] %vm1692_vm3, %v1667_v20 }
 0x229   :  { %v1191_v5 = vmul.f32 0.6931472, %v1982_v18  ;;  %v1137_v44 = vpop.xlane.xlu0 %1136 }
 0x22a   :  { %v1248_v58 = vadd.f32 %v1189_v3, %v3059_v38  ;;  %1987 = vlog2.f32 %v1137_v44  ;;  %v1139_v10 = vpop.xlane.xlu1 %1138  ;;  %v1604_v3 = vld [vmem:[%s3504_s5 + $0x40] sm:$0xff] }
 0x22b   :  { %v1984_v22 = vpop.eup %1983  ;;  %v1249_v21 = vadd.f32 %v1191_v5, %v3061_v28  ;;  %1989 = vlog2.f32 %v1139_v10  ;;  %v1616_v28 = vld [vmem:[%s3504_s5 + $0xa0] sm:$0xff] }
 0x22c   :  { %v1986_v0 = vpop.eup %1985  ;;  %v1632_v2 = vsub.f32 %v1248_v58, %v3079_v9  ;;  %v1221_v62 = vmul.f32 0.6931472, %v1984_v22  ;;  %v1605_v58 = vld [vmem:[%s3504_s5 + $0x48] sm:$0xff] }
 0x22d   :  { %v1633_v38 = vsub.f32 %v1249_v21, %v3081_v27  ;;  %v1223_v11 = vmul.f32 0.6931472, %v1986_v0  ;;  %v1169_v15 = vpop.xlane.xlu0 %1168 }
 0x22e   :  { %v1664_v53 = vmul.f32 %v1632_v2, %v1600_v52  ;;  %v1264_v33 = vadd.f32 %v1221_v62, %v3067_v59  ;;  %v1171_v25 = vpop.xlane.xlu1 %1170 }
 0x22f   :  { %v1665_v51 = vmul.f32 %v1633_v38, %v1601_v29  ;;  %v1265_v9 = vadd.f32 %v1223_v11, %v3069_v42 }
 0x230   :  { %1697 = vst.msk [vmem:[%s3506_s7 + $0x20] sm:$0xff] %vm1692_vm3, %v1664_v53  ;;  %v1648_v27 = vsub.f32 %v1264_v33, %v3212_v1 }
 0x231   :  { %1698 = vst.msk [vmem:[%s3506_s7 + $0x28] sm:$0xff] %vm1692_vm3, %v1665_v51  ;;  %v1649_v59 = vsub.f32 %v1265_v9, %v3208_v48  ;;  %v1133_v12 = vpop.xlane.xlu0 %1132 }
 0x232   :  { %v1680_v42 = vmul.f32 %v1648_v27, %v1616_v28  ;;  %1991 = vlog2.f32 %v1133_v12  ;;  %v1135_v26 = vpop.xlane.xlu1 %1134  ;;  %v3534_v12 = vld [vmem:[#allocation8_spill] sm:$0xff] }
 0x233   :  { %v1681_v17 = vmul.f32 %v1649_v59, %v1617_v63  ;;  %1993 = vlog2.f32 %v1135_v26  ;;  %v1618_v63 = vld [vmem:[%s3504_s5 + $0xb0] sm:$0xff] }
 0x234   :  { %1713 = vst.msk [vmem:[%s3506_s7 + $0xa0] sm:$0xff] %vm1692_vm3, %v1680_v42  ;;  %1995 = vlog2.f32 %v3252_v49  ;;  %v1607_v49 = vld [vmem:[%s3504_s5 + $0x58] sm:$0xff] }
 0x235   :  { %1714 = vst.msk [vmem:[%s3506_s7 + $0xa8] sm:$0xff] %vm1692_vm3, %v1681_v17  ;;  %1997 = vlog2.f32 %v3254_v50  ;;  %v1165_v35 = vpop.xlane.xlu0 %1164  ;;  %v3535_v17 = vld [vmem:[#allocation14_spill] sm:$0xff] }
 0x236   :  { %v1167_v32 = vpop.xlane.xlu1 %1166  ;;  %1999 = vlog2.f32 %v1165_v35  ;;  %v1610_v35 = vld [vmem:[%s3504_s5 + $0x70] sm:$0xff] }
 0x237   :  { %v1988_v1 = vpop.eup %1987  ;;  %2001 = vlog2.f32 %v1167_v32 }
 0x238   :  { %v1990_v43 = vpop.eup %1989  ;;  %v1201_v48 = vmul.f32 0.6931472, %v1988_v1 }
 0x239   :  { %v1203_v31 = vmul.f32 0.6931472, %v1990_v43 }
 0x23a   :  { %v1254_v41 = vadd.f32 %v1201_v48, %v3083_v16  ;;  %v1619_v48 = vld [vmem:[%s3504_s5 + $0xb8] sm:$0xff] }
 0x23b   :  { %v1255_v45 = vadd.f32 %v1203_v31, %v3532_v7 }
 0x23c   :  { %v1638_v55 = vsub.f32 %v1254_v41, %v3191_v8  ;;  %v3536_v41 = vld [vmem:[#allocation15_spill] sm:$0xff] }
 0x23d   :  { %v1639_v50 = vsub.f32 %v1255_v45, %v3193_v24  ;;  %v1145_v57 = vpop.xlane.xlu0 %1144 }
 0x23e   :  { %v1670_v40 = vmul.f32 %v1638_v55, %v1606_v19  ;;  %2003 = vlog2.f32 %v1145_v57  ;;  %v1147_v16 = vpop.xlane.xlu1 %1146  ;;  %v1611_v55 = vld [vmem:[%s3504_s5 + $0x78] sm:$0xff] }
 0x23f   :  { %v1992_v14 = vpop.eup %1991  ;;  %v1671_v56 = vmul.f32 %v1639_v50, %v1607_v49  ;;  %2005 = vlog2.f32 %v1147_v16  ;;  %v3537_v50 = vld [vmem:[#allocation12_spill] sm:$0xff] }
 0x240   :  { %v1994_v54 = vpop.eup %1993  ;;  %1703 = vst.msk [vmem:[%s3506_s7 + $0x50] sm:$0xff] %vm1692_vm3, %v1670_v40  ;;  %2007 = vlog2.f32 %v1169_v15  ;;  %v1197_v8 = vmul.f32 0.6931472, %v1992_v14 }
 0x241   :  { %1704 = vst.msk [vmem:[%s3506_s7 + $0x58] sm:$0xff] %vm1692_vm3, %v1671_v56  ;;  %2009 = vlog2.f32 %v1171_v25  ;;  %v1199_v24 = vmul.f32 0.6931472, %v1994_v54  ;;  %v1177_v4 = vpop.xlane.xlu0 %1176  ;;  %v1996_v10 = vpop.eup %1995  ;;  %v3533_v25 = vld [vmem:[#allocation7_spill] sm:$0xff] }
 0x242   :  { %v1252_v20 = vadd.f32 %v1197_v8, %v3099_v30  ;;  %v1179_v18 = vpop.xlane.xlu1 %1178  ;;  %v1998_v21 = vpop.eup %1997  ;;  %v1225_v29 = vmul.f32 0.6931472, %v1996_v10  ;;  %v1620_v56 = vld [vmem:[%s3504_s5 + $0xc0] sm:$0xff]  ;;  %v3538_v8 = vld [vmem:[#allocation13_spill] sm:$0xff] }
 0x243   :  { %v1253_v5 = vadd.f32 %v1199_v24, %v3101_v39  ;;  %v2000_v39 = vpop.eup %1999 }
 0x244   :  { %v1636_v44 = vsub.f32 %v1252_v20, %v3115_v23  ;;  %v1227_v23 = vmul.f32 0.6931472, %v1998_v21  ;;  %v2002_v62 = vpop.eup %2001  ;;  %v1229_v53 = vmul.f32 0.6931472, %v2000_v39  ;;  %v1266_v51 = vadd.f32 %v1225_v29, %v3533_v25  ;;  %v1621_v20 = vld [vmem:[%s3504_s5 + $0xc8] sm:$0xff]  ;;  %v3540_v39 = vld [vmem:[#allocation11_spill] sm:$0xff] }
 0x245   :  { %v1637_v22 = vsub.f32 %v1253_v5, %v3117_v13  ;;  %v1141_v52 = vpop.xlane.xlu0 %1140  ;;  %v1231_v9 = vmul.f32 0.6931472, %v2002_v62 }
 0x246   :  { %v1668_v0 = vmul.f32 %v1636_v44, %v1604_v3  ;;  %2011 = vlog2.f32 %v1141_v52  ;;  %v1143_v30 = vpop.xlane.xlu1 %1142  ;;  %v1267_v42 = vadd.f32 %v1227_v23, %v3534_v12  ;;  %v1268_v57 = vadd.f32 %v1229_v53, %v3537_v50 }
 0x247   :  { %v1669_v2 = vmul.f32 %v1637_v22, %v1605_v58  ;;  %2013 = vlog2.f32 %v1143_v30  ;;  %v1269_v24 = vadd.f32 %v1231_v9, %v3538_v8  ;;  %v3539_v22 = vld [vmem:[#allocation10_spill] sm:$0xff] }
 0x248   :  { %1701 = vst.msk [vmem:[%s3506_s7 + $0x40] sm:$0xff] %vm1692_vm3, %v1668_v0  ;;  %2015 = vlog2.f32 %v1177_v4 }
 0x249   :  { %1702 = vst.msk [vmem:[%s3506_s7 + $0x48] sm:$0xff] %vm1692_vm3, %v1669_v2  ;;  %2017 = vlog2.f32 %v1179_v18  ;;  %v1173_v13 = vpop.xlane.xlu0 %1172  ;;  %v1622_v2 = vld [vmem:[%s3504_s5 + $0xd0] sm:$0xff] }
 0x24a   :  { %2019 = vlog2.f32 %v1173_v13  ;;  %v1175_v38 = vpop.xlane.xlu1 %1174 }
 0x24b   :  { %v2004_v11 = vpop.eup %2003  ;;  %2021 = vlog2.f32 %v1175_v38 }
 0x24c   :  { %v2006_v15 = vpop.eup %2005  ;;  %v1209_v33 = vmul.f32 0.6931472, %v2004_v11  ;;  %v1623_v11 = vld [vmem:[%s3504_s5 + $0xd8] sm:$0xff] }
 0x24d   :  { %v2008_v28 = vpop.eup %2007  ;;  %v1211_v27 = vmul.f32 0.6931472, %v2006_v15  ;;  %v1577_v59 = vpop.xlane.xlu0 %1576 }
 0x24e   :  { %v2010_v26 = vpop.eup %2009  ;;  %v1258_v1 = vadd.f32 %v1209_v33, %v3535_v17  ;;  %v1650_v43 = vsub.f32 %v1266_v51, %v1577_v59  ;;  %v1579_v31 = vpop.xlane.xlu1 %1578  ;;  %v1233_v7 = vmul.f32 0.6931472, %v2008_v28  ;;  %v1608_v33 = vld [vmem:[%s3504_s5 + $0x60] sm:$0xff] }
 0x24f   :  { %v1259_v32 = vadd.f32 %v1211_v27, %v3536_v41  ;;  %v1651_v19 = vsub.f32 %v1267_v42, %v1579_v31  ;;  %v1235_v40 = vmul.f32 0.6931472, %v2010_v26  ;;  %v1609_v27 = vld [vmem:[%s3504_s5 + $0x68] sm:$0xff] }
 0x250   :  { %v1642_v45 = vsub.f32 %v1258_v1, %v3199_v34  ;;  %v1682_v49 = vmul.f32 %v1650_v43, %v1618_v63  ;;  %v1270_v52 = vadd.f32 %v1233_v7, %v3539_v22  ;;  %v3541_v41 = vld [vmem:[#allocation16_spill] sm:$0xff] }
 0x251   :  { %v1643_v16 = vsub.f32 %v1259_v32, %v3210_v6  ;;  %v1683_v14 = vmul.f32 %v1651_v19, %v1619_v48  ;;  %v1581_v54 = vpop.xlane.xlu0 %1580  ;;  %v1271_v23 = vadd.f32 %v1235_v40, %v3540_v39 }
 0x252   :  { %v1674_v4 = vmul.f32 %v1642_v45, %v1610_v35  ;;  %1715 = vst.msk [vmem:[%s3506_s7 + $0xb0] sm:$0xff] %vm1692_vm3, %v1682_v49  ;;  %v1652_v34 = vsub.f32 %v1268_v57, %v1581_v54  ;;  %v1583_v6 = vpop.xlane.xlu1 %1582  ;;  %v3542_v45 = vld [vmem:[#allocation17_spill] sm:$0xff]  ;;  %v1627_v57 = vld [vmem:[%s3504_s5 + $0xf8] sm:$0xff] }
 0x253   :  { %v2012_v18 = vpop.eup %2011  ;;  %v1675_v3 = vmul.f32 %v1643_v16, %v1611_v55  ;;  %1716 = vst.msk [vmem:[%s3506_s7 + $0xb8] sm:$0xff] %vm1692_vm3, %v1683_v14  ;;  %v1653_v5 = vsub.f32 %v1269_v24, %v1583_v6 }
 0x254   :  { %v2014_v44 = vpop.eup %2013  ;;  %1707 = vst.msk [vmem:[%s3506_s7 + $0x70] sm:$0xff] %vm1692_vm3, %v1674_v4  ;;  %v1205_v58 = vmul.f32 0.6931472, %v2012_v18  ;;  %v1684_v10 = vmul.f32 %v1652_v34, %v1620_v56 }
 0x255   :  { %v2016_v21 = vpop.eup %2015  ;;  %1708 = vst.msk [vmem:[%s3506_s7 + $0x78] sm:$0xff] %vm1692_vm3, %v1675_v3  ;;  %v1207_v0 = vmul.f32 0.6931472, %v2014_v44  ;;  %v1685_v30 = vmul.f32 %v1653_v5, %v1621_v20  ;;  %v1585_v29 = vpop.xlane.xlu0 %1584 }
 0x256   :  { %v2018_v13 = vpop.eup %2017  ;;  %v1256_v62 = vadd.f32 %v1205_v58, %v3135_v47  ;;  %1717 = vst.msk [vmem:[%s3506_s7 + $0xc0] sm:$0xff] %vm1692_vm3, %v1684_v10  ;;  %v1654_v38 = vsub.f32 %v1270_v52, %v1585_v29  ;;  %v1587_v15 = vpop.xlane.xlu1 %1586  ;;  %v1241_v28 = vmul.f32 0.6931472, %v2016_v21 }
 0x257   :  { %v2020_v53 = vpop.eup %2019  ;;  %v1257_v25 = vadd.f32 %v1207_v0, %v3137_v61  ;;  %1718 = vst.msk [vmem:[%s3506_s7 + $0xc8] sm:$0xff] %vm1692_vm3, %v1685_v30  ;;  %v1655_v47 = vsub.f32 %v1271_v23, %v1587_v15  ;;  %v1243_v12 = vmul.f32 0.6931472, %v2018_v13 }
 0x258   :  { %v2022_v51 = vpop.eup %2021  ;;  %v1640_v9 = vsub.f32 %v1256_v62, %v3195_v36  ;;  %v1237_v63 = vmul.f32 0.6931472, %v2020_v53  ;;  %v1686_v59 = vmul.f32 %v1654_v38, %v1622_v2  ;;  %v1274_v32 = vadd.f32 %v1241_v28, %v3541_v41 }
 0x259   :  { %v1641_v42 = vsub.f32 %v1257_v25, %v3214_v37  ;;  %v1239_v61 = vmul.f32 0.6931472, %v2022_v51  ;;  %v1687_v26 = vmul.f32 %v1655_v47, %v1623_v11  ;;  %v1589_v17 = vpop.xlane.xlu0 %1588  ;;  %v1624_v37 = vld [vmem:[%s3504_s5 + $0xe0] sm:$0xff]  ;;  %v1275_v55 = vadd.f32 %v1243_v12, %v3542_v45 }
 0x25a   :  { %v1672_v1 = vmul.f32 %v1640_v9, %v1608_v33  ;;  %1719 = vst.msk [vmem:[%s3506_s7 + $0xd0] sm:$0xff] %vm1692_vm3, %v1686_v59  ;;  %v1272_v36 = vadd.f32 %v1237_v63, %v3143_v46  ;;  %v1591_v43 = vpop.xlane.xlu1 %1590  ;;  %v1625_v46 = vld [vmem:[%s3504_s5 + $0xe8] sm:$0xff] }
 0x25b   :  { %v1673_v48 = vmul.f32 %v1641_v42, %v1609_v27  ;;  %1720 = vst.msk [vmem:[%s3506_s7 + $0xd8] sm:$0xff] %vm1692_vm3, %v1687_v26  ;;  %v1273_v31 = vadd.f32 %v1239_v61, %v3145_v60  ;;  %v1626_v60 = vld [vmem:[%s3504_s5 + $0xf0] sm:$0xff] }
 0x25c   :  { %1705 = vst.msk [vmem:[%s3506_s7 + $0x60] sm:$0xff] %vm1692_vm3, %v1672_v1  ;;  %v1656_v35 = vsub.f32 %v1272_v36, %v1589_v17 }
 0x25d   :  { %1706 = vst.msk [vmem:[%s3506_s7 + $0x68] sm:$0xff] %vm1692_vm3, %v1673_v48  ;;  %v1657_v19 = vsub.f32 %v1273_v31, %v1591_v43  ;;  %v1593_v7 = vpop.xlane.xlu0 %1592 }
 0x25e   :  { %v1688_v49 = vmul.f32 %v1656_v35, %v1624_v37  ;;  %v1658_v50 = vsub.f32 %v1274_v32, %v1593_v7  ;;  %v1595_v40 = vpop.xlane.xlu1 %1594 }
 0x25f   :  { %v1689_v16 = vmul.f32 %v1657_v19, %v1625_v46  ;;  %v1659_v14 = vsub.f32 %v1275_v55, %v1595_v40 }
 0x260   :  { %1721 = vst.msk [vmem:[%s3506_s7 + $0xe0] sm:$0xff] %vm1692_vm3, %v1688_v49  ;;  %v1690_v56 = vmul.f32 %v1658_v50, %v1626_v60 }
 0x261   :  { %1722 = vst.msk [vmem:[%s3506_s7 + $0xe8] sm:$0xff] %vm1692_vm3, %v1689_v16  ;;  %v1691_v54 = vmul.f32 %v1659_v14, %v1627_v57 }
 0x262   :  { %1723 = vst.msk [vmem:[%s3506_s7 + $0xf0] sm:$0xff] %vm1692_vm3, %v1690_v56 }
 0x263   :  { %1724 = vst.msk [vmem:[%s3506_s7 + $0xf8] sm:$0xff] %vm1692_vm3, %v1691_v54 }
 0x264   :  { %2043 = dma.done.wait [#allocation5], 4096  }
 0x265   :  { %2044 = vsyncadd [#allocation5], 4294963200 }
 0x266   :  { %1744 = vsyncpa [#allocation5], 1 }

</bundles_post_ra>
